<compile_context>
chip_gen: v7x
topology: tpu7x:2x2x1
jax: 0.10.0
libtpu: 0.0.40
codegen_flags: <defaults>
</compile_context>

<pallas_src>
import math

import numpy as np
import jax
import jax.numpy as jnp
from jax import lax
from jax.experimental import pallas as pl
from jax.experimental.pallas import tpu as pltpu

TRAIN_IN = 10     # hard-coded in the reference forward
TRAIN_OUT = 10    # hard-coded in the reference forward
SCALE_H = 4       # reference scales only the first 4 features of encoder_output

GP = 128          # per-gate lane padding (gate block b sits at lanes [b*GP, b*GP+H))
KP = 128          # lane width of the packed data slab

# Row layout of the packed data slab (rows x 128 lanes, f32):
_X_ROW = 0                      # rows [0, 10):  inputs[0, :10, :D]   in lanes [0, D)
_ENC_ROW = 16                   # rows [16, 26): encoder_output[0]    in lanes [0, H)
_H0_ROW = 32                    # row 32:        h0[0, 0]             in lanes [0, H)
_C0_ROW = 33                    # row 33:        c0[0, 0]             in lanes [0, H)
_DATA_ROWS = 34


# ----------------------------------------------------------------------------
# Fused kernel: LSTM (torch gate order i, f, g, o) over batch 0, followed by
# the hand-rolled attention (bugs kept), producing (TRAIN_OUT, 2H) in one shot.
# ----------------------------------------------------------------------------
def _make_kernel(H):
    W_HH_ROW0 = KP              # weight slab rows [0,128)=W_ih^T, [128,128+H)=W_hh^T
    B_ROW = KP + H              # row 128+H = fused bias

    def kernel(w_ref, d_ref, out_ref, xp_ref, att_ref):
        # w_ref  : (KP + H + 1, 4*GP)  gate-padded, transposed, pre-scaled params
        # d_ref  : (_DATA_ROWS, KP)    packed batch-0 activations
        # out_ref: (TRAIN_OUT, 2*H)
        # xp_ref : (TRAIN_OUT, 4*GP)   scratch: hoisted input projection
        # att_ref: (TRAIN_OUT, H)      scratch: LSTM hidden states (att_output[0])
        wih_t = w_ref[0:KP, :]                               # (128, 512)
        whh_t = w_ref[W_HH_ROW0:W_HH_ROW0 + H, :]            # (H, 512), stays in vregs
        bias = w_ref[B_ROW:B_ROW + 1, :]                     # (1, 512)

        x0 = d_ref[_X_ROW:_X_ROW + TRAIN_OUT, :]             # (10, 128), zero beyond D
        enc = d_ref[_ENC_ROW:_ENC_ROW + TRAIN_IN, 0:H]       # (10, H)
        h = d_ref[_H0_ROW:_H0_ROW + 1, 0:H]                  # (1, H)
        c = d_ref[_C0_ROW:_C0_ROW + 1, 0:H]                  # (1, H)

        # Hoisted input projection + bias (one MXU dot, off the serial chain).
        xp_ref[...] = jnp.dot(x0, wih_t,
                              preferred_element_type=jnp.float32) + bias   # (10, 512)

        # ---- LSTM recurrence, fully unrolled (TRAIN_OUT is static) ----
        # i/f/o rows were pre-scaled by 0.5, so one tanh recovers both
        # sigmoid (0.5*tanh(0.5 a) + 0.5) and tanh(g) in a single EUP pass.
        # NOTE: a VPU/XLU (broadcast + sublane-reduce) form of h@W_hh^T could
        # shave a little MXU pop latency; kept as the MXU dot here.
        for t in range(TRAIN_OUT):
            pre = xp_ref[t:t + 1, :] + jnp.dot(
                h, whh_t, preferred_element_type=jnp.float32)              # (1, 512)
            tt = jnp.tanh(pre)
            u = 0.5 * tt + 0.5
            i_g = u[:, 0 * GP:0 * GP + H]        # gate blocks are 128-aligned:
            f_g = u[:, 1 * GP:1 * GP + H]        # no lane rotations on the chain
            g_g = tt[:, 2 * GP:2 * GP + H]
            o_g = u[:, 3 * GP:3 * GP + H]
            c = f_g * c + i_g * g_g
            h = o_g * jnp.tanh(c)
            att_ref[t:t + 1, :] = h              # vst slot, off the critical chain

        att = att_ref[...]                       # (10, H) == att_output[0, :10]

        # ---- attention (reference bugs preserved) ----
        # scores[l, k] = exp(att[l] . enc[k])
        scores = jnp.exp(lax.dot_general(att, enc, (((1,), (1,)), ((), ())),
                                         preferred_element_type=jnp.float32))
        row_sum = jnp.sum(scores, axis=1, keepdims=True)                   # (10, 1)

        # Bug 1: only the last column is "normalized", divided by row_sum 10x.
        s2 = row_sum * row_sum
        s4 = s2 * s2
        s8 = s4 * s4
        inv10 = pl.reciprocal(s8 * s2, approx=True)                        # 1/row_sum**10
        col = lax.broadcasted_iota(jnp.int32, scores.shape, 1)
        weight = scores * jnp.where(col == TRAIN_IN - 1, inv10, 1.0)

        # Bug 2: in-place encoder mutation => running cumulative product over l.
        # log2-depth Hillis-Steele prefix product: 4 dependent multiplies,
        # static shifts (jnp.roll with a python shift = slice + concat).
        row = lax.broadcasted_iota(jnp.int32, weight.shape, 0)
        cw = weight
        for s in (1, 2, 4, 8):
            cw = cw * jnp.where(row >= s, jnp.roll(cw, s, axis=0), 1.0)

        weighted = jnp.dot(cw, enc, preferred_element_type=jnp.float32)    # (10, H)
        const = jnp.sum(enc, axis=0, keepdims=True)                        # (1, H)
        feat = lax.broadcasted_iota(jnp.int32, weighted.shape, 1)
        cn = jnp.where(feat < SCALE_H, weighted, const)                    # (10, H)

        # Two lane-sliced stores instead of a concatenate.
        out_ref[:, 0:H] = cn
        out_ref[:, H:2 * H] = att

    return kernel


# ----------------------------------------------------------------------------
# Wrapper: pack everything into 2 f32 slabs (2 input DMAs), call the kernel.
# ----------------------------------------------------------------------------
def _pack_weights(w_ih, w_hh, b_ih, b_hh, H, D):
    """Gate-pad (128-lane blocks), transpose, and pre-scale the LSTM params."""
    f32 = jnp.float32
    gate_scale = jnp.asarray([0.5, 0.5, 1.0, 0.5], f32)       # i, f, g, o

    def gate_pad_t(w, in_dim, in_pad):
        w4 = w.astype(f32).reshape(4, H, in_dim) * gate_scale[:, None, None]
        wp = jnp.zeros((4, GP, in_pad), f32).at[:, :H, :in_dim].set(w4)
        return wp.transpose(2, 0, 1).reshape(in_pad, 4 * GP)

    wih_t = gate_pad_t(w_ih, D, KP)                           # (128, 512)
    whh_t = gate_pad_t(w_hh, H, H)                            # (H, 512)  K kept at H
    b4 = (b_ih + b_hh).astype(f32).reshape(4, H) * gate_scale[:, None]
    bias = jnp.zeros((4, GP), f32).at[:, :H].set(b4).reshape(1, 4 * GP)
    return jnp.concatenate([wih_t, whh_t, bias], axis=0)      # (KP + H + 1, 512)


def _pack_data(inputs, h0, c0, encoder_output, H, D):
    """Pack batch-0 activations into one (34, 128) f32 slab (single DMA)."""
    f32 = jnp.float32
    slab = jnp.zeros((_DATA_ROWS, KP), f32)
    slab = slab.at[_X_ROW:_X_ROW + TRAIN_OUT, :D].set(inputs[0, :TRAIN_OUT].astype(f32))
    slab = slab.at[_ENC_ROW:_ENC_ROW + TRAIN_IN, :H].set(
        encoder_output[0, :TRAIN_IN].astype(f32))
    slab = slab.at[_H0_ROW, :H].set(h0[0, 0].astype(f32))
    slab = slab.at[_C0_ROW, :H].set(c0[0, 0].astype(f32))
    return slab


@jax.jit
def attention_forward(inputs, h0, c0, encoder_output, w_ih, w_hh, b_ih, b_hh):
    H = h0.shape[-1]
    D = inputs.shape[-1]
    assert inputs.shape[1] >= TRAIN_OUT and encoder_output.shape[1] >= TRAIN_IN
    assert H <= GP and D <= KP

    w_slab = _pack_weights(w_ih, w_hh, b_ih, b_hh, H, D)
    d_slab = _pack_data(inputs, h0, c0, encoder_output, H, D)

    out2d = pl.pallas_call(
        _make_kernel(H),
        out_shape=jax.ShapeDtypeStruct((TRAIN_OUT, 2 * H), jnp.float32),
        in_specs=[pl.BlockSpec(memory_space=pltpu.MemorySpace.VMEM)] * 2,
        out_specs=pl.BlockSpec(memory_space=pltpu.MemorySpace.VMEM),
        scratch_shapes=[pltpu.VMEM((TRAIN_OUT, 4 * GP), jnp.float32),
                        pltpu.VMEM((TRAIN_OUT, H), jnp.float32)],
    )(w_slab, d_slab)
    # Reference output only depends on batch 0 -> (1, TRAIN_OUT, 2H).
    return out2d[None]


# ----------------------------------------------------------------------------
# Pure-numpy reference that mirrors the PyTorch code loop-for-loop (bugs kept).
# ----------------------------------------------------------------------------
def reference_forward_np(inputs, h0, c0, encoder_output, w_ih, w_hh, b_ih, b_hh):
    x = np.asarray(inputs, np.float64)
    h = np.asarray(h0[0], np.float64)
    c = np.asarray(c0[0], np.float64)
    W_ih = np.asarray(w_ih, np.float64)
    W_hh = np.asarray(w_hh, np.float64)
    bi = np.asarray(b_ih, np.float64)
    bh = np.asarray(b_hh, np.float64)
    B, T, _ = x.shape
    H = h.shape[-1]

    def sig(z):
        return 1.0 / (1.0 + np.exp(-z))

    att = np.zeros((B, T, H))
    for t in range(T):
        g = x[:, t] @ W_ih.T + bi + h @ W_hh.T + bh
        i_g = sig(g[:, :H]); f_g = sig(g[:, H:2 * H])
        g_g = np.tanh(g[:, 2 * H:3 * H]); o_g = sig(g[:, 3 * H:])
        c = f_g * c + i_g * g_g
        h = o_g * np.tanh(c)
        att[:, t] = h

    enc = np.asarray(encoder_output, np.float64).copy()
    weight = np.ones((TRAIN_OUT, TRAIN_IN))
    for l in range(TRAIN_OUT):
        k_t_sum = 0.0
        for k in range(TRAIN_IN):
            k_t = math.exp(float(np.dot(att[0, l], enc[0, k])))
            weight[l][k] = k_t
            k_t_sum += k_t
        for _w in range(TRAIN_IN):
            weight[l][k] = weight[l][k] / k_t_sum   # bug kept: reuses final k
    cn = []
    for l in range(TRAIN_OUT):
        cn_sum = 0.0
        for k in range(TRAIN_IN):
            for hh in range(SCALE_H):
                enc[0][k][hh] = weight[l][k] * enc[0][k][hh]    # in-place bug kept
            cn_sum = cn_sum + enc[0][k]
        cn.append(cn_sum)
    out = np.stack([np.concatenate([cn[c_], att[0, c_]], axis=0)
                    for c_ in range(TRAIN_OUT)])
    return out[None].astype(np.float32)


if __name__ == "__main__":
    B, T, D_IN, H = 2, TRAIN_OUT, 8, 16

    key = jax.random.PRNGKey(0)
    k1, k2, k3, k4, k5, k6, k7, k8 = jax.random.split(key, 8)
    bound = 1.0 / math.sqrt(H)
    # nn.LSTM parameter shapes: weight_ih (4H, D_in), weight_hh (4H, H), biases (4H,)
    w_ih = jax.random.uniform(k1, (4 * H, D_IN), jnp.float32, -bound, bound)
    w_hh = jax.random.uniform(k2, (4 * H, H), jnp.float32, -bound, bound)
    b_ih = jax.random.uniform(k3, (4 * H,), jnp.float32, -bound, bound)
    b_hh = jax.random.uniform(k4, (4 * H,), jnp.float32, -bound, bound)

    inputs = 0.5 * jax.random.normal(k5, (B, T, D_IN), jnp.float32)
    h0 = 0.1 * jax.random.normal(k6, (1, B, H), jnp.float32)
    c0 = 0.1 * jax.random.normal(k7, (1, B, H), jnp.float32)
    encoder_output = 0.1 * jax.random.normal(k8, (B, TRAIN_IN, H), jnp.float32)

    out = attention_forward(inputs, h0, c0, encoder_output,
                            w_ih, w_hh, b_ih, b_hh)
    out = jax.block_until_ready(out)

    ref = reference_forward_np(np.asarray(inputs), np.asarray(h0), np.asarray(c0),
                               np.asarray(encoder_output), np.asarray(w_ih),
                               np.asarray(w_hh), np.asarray(b_ih), np.asarray(b_hh))

    assert out.shape == (1, TRAIN_OUT, 2 * H), out.shape
    np.testing.assert_allclose(np.asarray(out), ref, rtol=1e-3, atol=1e-3)
    print("KERNEL_OK")
</pallas_src>

<mosaic_0001>
module attributes {stable_mosaic.version = 11 : i64} {
  func.func @kernel(%arg0: memref<145x512xf32, #tpu.memory_space<vmem>>, %arg1: memref<34x128xf32, #tpu.memory_space<vmem>>, %arg2: memref<10x32xf32, #tpu.memory_space<vmem>>, %arg3: memref<10x512xf32, #tpu.memory_space<vmem>>, %arg4: memref<10x16xf32, #tpu.memory_space<vmem>>) attributes {dimension_semantics = [], scalar_prefetch = 0 : i64, scratch_operands = 2 : i64, tpu.core_type = #tpu.core_type<tc>} {
    %c0 = arith.constant 0 : index
    %c0_0 = arith.constant 0 : index
    %0 = vector.load %arg0[%c0, %c0_0] : memref<145x512xf32, #tpu.memory_space<vmem>>, vector<128x512xf32>
    %c128 = arith.constant 128 : index
    %c0_1 = arith.constant 0 : index
    %1 = vector.load %arg0[%c128, %c0_1] : memref<145x512xf32, #tpu.memory_space<vmem>>, vector<16x512xf32>
    %c144 = arith.constant 144 : index
    %c0_2 = arith.constant 0 : index
    %2 = vector.load %arg0[%c144, %c0_2] : memref<145x512xf32, #tpu.memory_space<vmem>>, vector<1x512xf32>
    %c0_3 = arith.constant 0 : index
    %c0_4 = arith.constant 0 : index
    %3 = vector.load %arg1[%c0_3, %c0_4] : memref<34x128xf32, #tpu.memory_space<vmem>>, vector<10x128xf32>
    %c16 = arith.constant 16 : index
    %c0_5 = arith.constant 0 : index
    %4 = vector.load %arg1[%c16, %c0_5] : memref<34x128xf32, #tpu.memory_space<vmem>>, vector<10x16xf32>
    %c32 = arith.constant 32 : index
    %c0_6 = arith.constant 0 : index
    %5 = vector.load %arg1[%c32, %c0_6] : memref<34x128xf32, #tpu.memory_space<vmem>>, vector<1x16xf32>
    %c33 = arith.constant 33 : index
    %c0_7 = arith.constant 0 : index
    %6 = vector.load %arg1[%c33, %c0_7] : memref<34x128xf32, #tpu.memory_space<vmem>>, vector<1x16xf32>
    %cst = arith.constant dense<0.000000e+00> : vector<10x512xf32>
    %7 = tpu.matmul %3, %0, %cst {dimension_numbers = #tpu.dot_dimension_numbers<[1], [0], [0], [1], [0, 0, 1, 1], [], []>} : vector<10x128xf32>, vector<128x512xf32>, vector<10x512xf32> -> vector<10x512xf32>
    %8 = vector.broadcast %2 : vector<1x512xf32> to vector<10x512xf32>
    %9 = arith.addf %7, %8 : vector<10x512xf32>
    %c0_8 = arith.constant 0 : index
    %c0_9 = arith.constant 0 : index
    %10 = vector.load %arg3[%c0_8, %c0_9] : memref<10x512xf32, #tpu.memory_space<vmem>>, vector<10x512xf32>
    tpu.vector_store %arg3[%c0_8, %c0_9], %9 {strides = array<i32>} : memref<10x512xf32, #tpu.memory_space<vmem>>, vector<10x512xf32>,
    %c0_10 = arith.constant 0 : index
    %c0_11 = arith.constant 0 : index
    %11 = vector.load %arg3[%c0_10, %c0_11] : memref<10x512xf32, #tpu.memory_space<vmem>>, vector<1x512xf32>
    %cst_12 = arith.constant dense<0.000000e+00> : vector<1x512xf32>
    %12 = tpu.matmul %5, %1, %cst_12 {dimension_numbers = #tpu.dot_dimension_numbers<[1], [0], [0], [1], [0, 0, 1, 1], [], []>} : vector<1x16xf32>, vector<16x512xf32>, vector<1x512xf32> -> vector<1x512xf32>
    %13 = arith.addf %11, %12 : vector<1x512xf32>
    %14 = math.tanh %13 : vector<1x512xf32>
    %cst_13 = arith.constant 5.000000e-01 : f32
    %15 = vector.broadcast %cst_13 : f32 to vector<1x512xf32>
    %16 = arith.mulf %15, %14 : vector<1x512xf32>
    %cst_14 = arith.constant 5.000000e-01 : f32
    %17 = vector.broadcast %cst_14 : f32 to vector<1x512xf32>
    %18 = arith.addf %16, %17 : vector<1x512xf32>
    %19 = vector.extract_strided_slice %18 {offsets = [0, 0], sizes = [1, 16], strides = [1, 1]} : vector<1x512xf32> to vector<1x16xf32>
    %20 = vector.extract_strided_slice %18 {offsets = [0, 128], sizes = [1, 16], strides = [1, 1]} : vector<1x512xf32> to vector<1x16xf32>
    %21 = vector.extract_strided_slice %14 {offsets = [0, 256], sizes = [1, 16], strides = [1, 1]} : vector<1x512xf32> to vector<1x16xf32>
    %22 = vector.extract_strided_slice %18 {offsets = [0, 384], sizes = [1, 16], strides = [1, 1]} : vector<1x512xf32> to vector<1x16xf32>
    %23 = arith.mulf %20, %6 : vector<1x16xf32>
    %24 = arith.mulf %19, %21 : vector<1x16xf32>
    %25 = arith.addf %23, %24 : vector<1x16xf32>
    %26 = math.tanh %25 : vector<1x16xf32>
    %27 = arith.mulf %22, %26 : vector<1x16xf32>
    %c0_15 = arith.constant 0 : index
    %c0_16 = arith.constant 0 : index
    %28 = vector.load %arg4[%c0_15, %c0_16] : memref<10x16xf32, #tpu.memory_space<vmem>>, vector<1x16xf32>
    tpu.vector_store %arg4[%c0_15, %c0_16], %27 {strides = array<i32>} : memref<10x16xf32, #tpu.memory_space<vmem>>, vector<1x16xf32>,
    %c1 = arith.constant 1 : index
    %c0_17 = arith.constant 0 : index
    %29 = vector.load %arg3[%c1, %c0_17] : memref<10x512xf32, #tpu.memory_space<vmem>>, vector<1x512xf32>
    %cst_18 = arith.constant dense<0.000000e+00> : vector<1x512xf32>
    %30 = tpu.matmul %27, %1, %cst_18 {dimension_numbers = #tpu.dot_dimension_numbers<[1], [0], [0], [1], [0, 0, 1, 1], [], []>} : vector<1x16xf32>, vector<16x512xf32>, vector<1x512xf32> -> vector<1x512xf32>
    %31 = arith.addf %29, %30 : vector<1x512xf32>
    %32 = math.tanh %31 : vector<1x512xf32>
    %cst_19 = arith.constant 5.000000e-01 : f32
    %33 = vector.broadcast %cst_19 : f32 to vector<1x512xf32>
    %34 = arith.mulf %33, %32 : vector<1x512xf32>
    %cst_20 = arith.constant 5.000000e-01 : f32
    %35 = vector.broadcast %cst_20 : f32 to vector<1x512xf32>
    %36 = arith.addf %34, %35 : vector<1x512xf32>
    %37 = vector.extract_strided_slice %36 {offsets = [0, 0], sizes = [1, 16], strides = [1, 1]} : vector<1x512xf32> to vector<1x16xf32>
    %38 = vector.extract_strided_slice %36 {offsets = [0, 128], sizes = [1, 16], strides = [1, 1]} : vector<1x512xf32> to vector<1x16xf32>
    %39 = vector.extract_strided_slice %32 {offsets = [0, 256], sizes = [1, 16], strides = [1, 1]} : vector<1x512xf32> to vector<1x16xf32>
    %40 = vector.extract_strided_slice %36 {offsets = [0, 384], sizes = [1, 16], strides = [1, 1]} : vector<1x512xf32> to vector<1x16xf32>
    %41 = arith.mulf %38, %25 : vector<1x16xf32>
    %42 = arith.mulf %37, %39 : vector<1x16xf32>
    %43 = arith.addf %41, %42 : vector<1x16xf32>
    %44 = math.tanh %43 : vector<1x16xf32>
    %45 = arith.mulf %40, %44 : vector<1x16xf32>
    %c1_21 = arith.constant 1 : index
    %c0_22 = arith.constant 0 : index
    %46 = vector.load %arg4[%c1_21, %c0_22] : memref<10x16xf32, #tpu.memory_space<vmem>>, vector<1x16xf32>
    tpu.vector_store %arg4[%c1_21, %c0_22], %45 {strides = array<i32>} : memref<10x16xf32, #tpu.memory_space<vmem>>, vector<1x16xf32>,
    %c2 = arith.constant 2 : index
    %c0_23 = arith.constant 0 : index
    %47 = vector.load %arg3[%c2, %c0_23] : memref<10x512xf32, #tpu.memory_space<vmem>>, vector<1x512xf32>
    %cst_24 = arith.constant dense<0.000000e+00> : vector<1x512xf32>
    %48 = tpu.matmul %45, %1, %cst_24 {dimension_numbers = #tpu.dot_dimension_numbers<[1], [0], [0], [1], [0, 0, 1, 1], [], []>} : vector<1x16xf32>, vector<16x512xf32>, vector<1x512xf32> -> vector<1x512xf32>
    %49 = arith.addf %47, %48 : vector<1x512xf32>
    %50 = math.tanh %49 : vector<1x512xf32>
    %cst_25 = arith.constant 5.000000e-01 : f32
    %51 = vector.broadcast %cst_25 : f32 to vector<1x512xf32>
    %52 = arith.mulf %51, %50 : vector<1x512xf32>
    %cst_26 = arith.constant 5.000000e-01 : f32
    %53 = vector.broadcast %cst_26 : f32 to vector<1x512xf32>
    %54 = arith.addf %52, %53 : vector<1x512xf32>
    %55 = vector.extract_strided_slice %54 {offsets = [0, 0], sizes = [1, 16], strides = [1, 1]} : vector<1x512xf32> to vector<1x16xf32>
    %56 = vector.extract_strided_slice %54 {offsets = [0, 128], sizes = [1, 16], strides = [1, 1]} : vector<1x512xf32> to vector<1x16xf32>
    %57 = vector.extract_strided_slice %50 {offsets = [0, 256], sizes = [1, 16], strides = [1, 1]} : vector<1x512xf32> to vector<1x16xf32>
    %58 = vector.extract_strided_slice %54 {offsets = [0, 384], sizes = [1, 16], strides = [1, 1]} : vector<1x512xf32> to vector<1x16xf32>
    %59 = arith.mulf %56, %43 : vector<1x16xf32>
    %60 = arith.mulf %55, %57 : vector<1x16xf32>
    %61 = arith.addf %59, %60 : vector<1x16xf32>
    %62 = math.tanh %61 : vector<1x16xf32>
    %63 = arith.mulf %58, %62 : vector<1x16xf32>
    %c2_27 = arith.constant 2 : index
    %c0_28 = arith.constant 0 : index
    %64 = vector.load %arg4[%c2_27, %c0_28] : memref<10x16xf32, #tpu.memory_space<vmem>>, vector<1x16xf32>
    tpu.vector_store %arg4[%c2_27, %c0_28], %63 {strides = array<i32>} : memref<10x16xf32, #tpu.memory_space<vmem>>, vector<1x16xf32>,
    %c3 = arith.constant 3 : index
    %c0_29 = arith.constant 0 : index
    %65 = vector.load %arg3[%c3, %c0_29] : memref<10x512xf32, #tpu.memory_space<vmem>>, vector<1x512xf32>
    %cst_30 = arith.constant dense<0.000000e+00> : vector<1x512xf32>
    %66 = tpu.matmul %63, %1, %cst_30 {dimension_numbers = #tpu.dot_dimension_numbers<[1], [0], [0], [1], [0, 0, 1, 1], [], []>} : vector<1x16xf32>, vector<16x512xf32>, vector<1x512xf32> -> vector<1x512xf32>
    %67 = arith.addf %65, %66 : vector<1x512xf32>
    %68 = math.tanh %67 : vector<1x512xf32>
    %cst_31 = arith.constant 5.000000e-01 : f32
    %69 = vector.broadcast %cst_31 : f32 to vector<1x512xf32>
    %70 = arith.mulf %69, %68 : vector<1x512xf32>
    %cst_32 = arith.constant 5.000000e-01 : f32
    %71 = vector.broadcast %cst_32 : f32 to vector<1x512xf32>
    %72 = arith.addf %70, %71 : vector<1x512xf32>
    %73 = vector.extract_strided_slice %72 {offsets = [0, 0], sizes = [1, 16], strides = [1, 1]} : vector<1x512xf32> to vector<1x16xf32>
    %74 = vector.extract_strided_slice %72 {offsets = [0, 128], sizes = [1, 16], strides = [1, 1]} : vector<1x512xf32> to vector<1x16xf32>
    %75 = vector.extract_strided_slice %68 {offsets = [0, 256], sizes = [1, 16], strides = [1, 1]} : vector<1x512xf32> to vector<1x16xf32>
    %76 = vector.extract_strided_slice %72 {offsets = [0, 384], sizes = [1, 16], strides = [1, 1]} : vector<1x512xf32> to vector<1x16xf32>
    %77 = arith.mulf %74, %61 : vector<1x16xf32>
    %78 = arith.mulf %73, %75 : vector<1x16xf32>
    %79 = arith.addf %77, %78 : vector<1x16xf32>
    %80 = math.tanh %79 : vector<1x16xf32>
    %81 = arith.mulf %76, %80 : vector<1x16xf32>
    %c3_33 = arith.constant 3 : index
    %c0_34 = arith.constant 0 : index
    %82 = vector.load %arg4[%c3_33, %c0_34] : memref<10x16xf32, #tpu.memory_space<vmem>>, vector<1x16xf32>
    tpu.vector_store %arg4[%c3_33, %c0_34], %81 {strides = array<i32>} : memref<10x16xf32, #tpu.memory_space<vmem>>, vector<1x16xf32>,
    %c4 = arith.constant 4 : index
    %c0_35 = arith.constant 0 : index
    %83 = vector.load %arg3[%c4, %c0_35] : memref<10x512xf32, #tpu.memory_space<vmem>>, vector<1x512xf32>
    %cst_36 = arith.constant dense<0.000000e+00> : vector<1x512xf32>
    %84 = tpu.matmul %81, %1, %cst_36 {dimension_numbers = #tpu.dot_dimension_numbers<[1], [0], [0], [1], [0, 0, 1, 1], [], []>} : vector<1x16xf32>, vector<16x512xf32>, vector<1x512xf32> -> vector<1x512xf32>
    %85 = arith.addf %83, %84 : vector<1x512xf32>
    %86 = math.tanh %85 : vector<1x512xf32>
    %cst_37 = arith.constant 5.000000e-01 : f32
    %87 = vector.broadcast %cst_37 : f32 to vector<1x512xf32>
    %88 = arith.mulf %87, %86 : vector<1x512xf32>
    %cst_38 = arith.constant 5.000000e-01 : f32
    %89 = vector.broadcast %cst_38 : f32 to vector<1x512xf32>
    %90 = arith.addf %88, %89 : vector<1x512xf32>
    %91 = vector.extract_strided_slice %90 {offsets = [0, 0], sizes = [1, 16], strides = [1, 1]} : vector<1x512xf32> to vector<1x16xf32>
    %92 = vector.extract_strided_slice %90 {offsets = [0, 128], sizes = [1, 16], strides = [1, 1]} : vector<1x512xf32> to vector<1x16xf32>
    %93 = vector.extract_strided_slice %86 {offsets = [0, 256], sizes = [1, 16], strides = [1, 1]} : vector<1x512xf32> to vector<1x16xf32>
    %94 = vector.extract_strided_slice %90 {offsets = [0, 384], sizes = [1, 16], strides = [1, 1]} : vector<1x512xf32> to vector<1x16xf32>
    %95 = arith.mulf %92, %79 : vector<1x16xf32>
    %96 = arith.mulf %91, %93 : vector<1x16xf32>
    %97 = arith.addf %95, %96 : vector<1x16xf32>
    %98 = math.tanh %97 : vector<1x16xf32>
    %99 = arith.mulf %94, %98 : vector<1x16xf32>
    %c4_39 = arith.constant 4 : index
    %c0_40 = arith.constant 0 : index
    %100 = vector.load %arg4[%c4_39, %c0_40] : memref<10x16xf32, #tpu.memory_space<vmem>>, vector<1x16xf32>
    tpu.vector_store %arg4[%c4_39, %c0_40], %99 {strides = array<i32>} : memref<10x16xf32, #tpu.memory_space<vmem>>, vector<1x16xf32>,
    %c5 = arith.constant 5 : index
    %c0_41 = arith.constant 0 : index
    %101 = vector.load %arg3[%c5, %c0_41] : memref<10x512xf32, #tpu.memory_space<vmem>>, vector<1x512xf32>
    %cst_42 = arith.constant dense<0.000000e+00> : vector<1x512xf32>
    %102 = tpu.matmul %99, %1, %cst_42 {dimension_numbers = #tpu.dot_dimension_numbers<[1], [0], [0], [1], [0, 0, 1, 1], [], []>} : vector<1x16xf32>, vector<16x512xf32>, vector<1x512xf32> -> vector<1x512xf32>
    %103 = arith.addf %101, %102 : vector<1x512xf32>
    %104 = math.tanh %103 : vector<1x512xf32>
    %cst_43 = arith.constant 5.000000e-01 : f32
    %105 = vector.broadcast %cst_43 : f32 to vector<1x512xf32>
    %106 = arith.mulf %105, %104 : vector<1x512xf32>
    %cst_44 = arith.constant 5.000000e-01 : f32
    %107 = vector.broadcast %cst_44 : f32 to vector<1x512xf32>
    %108 = arith.addf %106, %107 : vector<1x512xf32>
    %109 = vector.extract_strided_slice %108 {offsets = [0, 0], sizes = [1, 16], strides = [1, 1]} : vector<1x512xf32> to vector<1x16xf32>
    %110 = vector.extract_strided_slice %108 {offsets = [0, 128], sizes = [1, 16], strides = [1, 1]} : vector<1x512xf32> to vector<1x16xf32>
    %111 = vector.extract_strided_slice %104 {offsets = [0, 256], sizes = [1, 16], strides = [1, 1]} : vector<1x512xf32> to vector<1x16xf32>
    %112 = vector.extract_strided_slice %108 {offsets = [0, 384], sizes = [1, 16], strides = [1, 1]} : vector<1x512xf32> to vector<1x16xf32>
    %113 = arith.mulf %110, %97 : vector<1x16xf32>
    %114 = arith.mulf %109, %111 : vector<1x16xf32>
    %115 = arith.addf %113, %114 : vector<1x16xf32>
    %116 = math.tanh %115 : vector<1x16xf32>
    %117 = arith.mulf %112, %116 : vector<1x16xf32>
    %c5_45 = arith.constant 5 : index
    %c0_46 = arith.constant 0 : index
    %118 = vector.load %arg4[%c5_45, %c0_46] : memref<10x16xf32, #tpu.memory_space<vmem>>, vector<1x16xf32>
    tpu.vector_store %arg4[%c5_45, %c0_46], %117 {strides = array<i32>} : memref<10x16xf32, #tpu.memory_space<vmem>>, vector<1x16xf32>,
    %c6 = arith.constant 6 : index
    %c0_47 = arith.constant 0 : index
    %119 = vector.load %arg3[%c6, %c0_47] : memref<10x512xf32, #tpu.memory_space<vmem>>, vector<1x512xf32>
    %cst_48 = arith.constant dense<0.000000e+00> : vector<1x512xf32>
    %120 = tpu.matmul %117, %1, %cst_48 {dimension_numbers = #tpu.dot_dimension_numbers<[1], [0], [0], [1], [0, 0, 1, 1], [], []>} : vector<1x16xf32>, vector<16x512xf32>, vector<1x512xf32> -> vector<1x512xf32>
    %121 = arith.addf %119, %120 : vector<1x512xf32>
    %122 = math.tanh %121 : vector<1x512xf32>
    %cst_49 = arith.constant 5.000000e-01 : f32
    %123 = vector.broadcast %cst_49 : f32 to vector<1x512xf32>
    %124 = arith.mulf %123, %122 : vector<1x512xf32>
    %cst_50 = arith.constant 5.000000e-01 : f32
    %125 = vector.broadcast %cst_50 : f32 to vector<1x512xf32>
    %126 = arith.addf %124, %125 : vector<1x512xf32>
    %127 = vector.extract_strided_slice %126 {offsets = [0, 0], sizes = [1, 16], strides = [1, 1]} : vector<1x512xf32> to vector<1x16xf32>
    %128 = vector.extract_strided_slice %126 {offsets = [0, 128], sizes = [1, 16], strides = [1, 1]} : vector<1x512xf32> to vector<1x16xf32>
    %129 = vector.extract_strided_slice %122 {offsets = [0, 256], sizes = [1, 16], strides = [1, 1]} : vector<1x512xf32> to vector<1x16xf32>
    %130 = vector.extract_strided_slice %126 {offsets = [0, 384], sizes = [1, 16], strides = [1, 1]} : vector<1x512xf32> to vector<1x16xf32>
    %131 = arith.mulf %128, %115 : vector<1x16xf32>
    %132 = arith.mulf %127, %129 : vector<1x16xf32>
    %133 = arith.addf %131, %132 : vector<1x16xf32>
    %134 = math.tanh %133 : vector<1x16xf32>
    %135 = arith.mulf %130, %134 : vector<1x16xf32>
    %c6_51 = arith.constant 6 : index
    %c0_52 = arith.constant 0 : index
    %136 = vector.load %arg4[%c6_51, %c0_52] : memref<10x16xf32, #tpu.memory_space<vmem>>, vector<1x16xf32>
    tpu.vector_store %arg4[%c6_51, %c0_52], %135 {strides = array<i32>} : memref<10x16xf32, #tpu.memory_space<vmem>>, vector<1x16xf32>,
    %c7 = arith.constant 7 : index
    %c0_53 = arith.constant 0 : index
    %137 = vector.load %arg3[%c7, %c0_53] : memref<10x512xf32, #tpu.memory_space<vmem>>, vector<1x512xf32>
    %cst_54 = arith.constant dense<0.000000e+00> : vector<1x512xf32>
    %138 = tpu.matmul %135, %1, %cst_54 {dimension_numbers = #tpu.dot_dimension_numbers<[1], [0], [0], [1], [0, 0, 1, 1], [], []>} : vector<1x16xf32>, vector<16x512xf32>, vector<1x512xf32> -> vector<1x512xf32>
    %139 = arith.addf %137, %138 : vector<1x512xf32>
    %140 = math.tanh %139 : vector<1x512xf32>
    %cst_55 = arith.constant 5.000000e-01 : f32
    %141 = vector.broadcast %cst_55 : f32 to vector<1x512xf32>
    %142 = arith.mulf %141, %140 : vector<1x512xf32>
    %cst_56 = arith.constant 5.000000e-01 : f32
    %143 = vector.broadcast %cst_56 : f32 to vector<1x512xf32>
    %144 = arith.addf %142, %143 : vector<1x512xf32>
    %145 = vector.extract_strided_slice %144 {offsets = [0, 0], sizes = [1, 16], strides = [1, 1]} : vector<1x512xf32> to vector<1x16xf32>
    %146 = vector.extract_strided_slice %144 {offsets = [0, 128], sizes = [1, 16], strides = [1, 1]} : vector<1x512xf32> to vector<1x16xf32>
    %147 = vector.extract_strided_slice %140 {offsets = [0, 256], sizes = [1, 16], strides = [1, 1]} : vector<1x512xf32> to vector<1x16xf32>
    %148 = vector.extract_strided_slice %144 {offsets = [0, 384], sizes = [1, 16], strides = [1, 1]} : vector<1x512xf32> to vector<1x16xf32>
    %149 = arith.mulf %146, %133 : vector<1x16xf32>
    %150 = arith.mulf %145, %147 : vector<1x16xf32>
    %151 = arith.addf %149, %150 : vector<1x16xf32>
    %152 = math.tanh %151 : vector<1x16xf32>
    %153 = arith.mulf %148, %152 : vector<1x16xf32>
    %c7_57 = arith.constant 7 : index
    %c0_58 = arith.constant 0 : index
    %154 = vector.load %arg4[%c7_57, %c0_58] : memref<10x16xf32, #tpu.memory_space<vmem>>, vector<1x16xf32>
    tpu.vector_store %arg4[%c7_57, %c0_58], %153 {strides = array<i32>} : memref<10x16xf32, #tpu.memory_space<vmem>>, vector<1x16xf32>,
    %c8 = arith.constant 8 : index
    %c0_59 = arith.constant 0 : index
    %155 = vector.load %arg3[%c8, %c0_59] : memref<10x512xf32, #tpu.memory_space<vmem>>, vector<1x512xf32>
    %cst_60 = arith.constant dense<0.000000e+00> : vector<1x512xf32>
    %156 = tpu.matmul %153, %1, %cst_60 {dimension_numbers = #tpu.dot_dimension_numbers<[1], [0], [0], [1], [0, 0, 1, 1], [], []>} : vector<1x16xf32>, vector<16x512xf32>, vector<1x512xf32> -> vector<1x512xf32>
    %157 = arith.addf %155, %156 : vector<1x512xf32>
    %158 = math.tanh %157 : vector<1x512xf32>
    %cst_61 = arith.constant 5.000000e-01 : f32
    %159 = vector.broadcast %cst_61 : f32 to vector<1x512xf32>
    %160 = arith.mulf %159, %158 : vector<1x512xf32>
    %cst_62 = arith.constant 5.000000e-01 : f32
    %161 = vector.broadcast %cst_62 : f32 to vector<1x512xf32>
    %162 = arith.addf %160, %161 : vector<1x512xf32>
    %163 = vector.extract_strided_slice %162 {offsets = [0, 0], sizes = [1, 16], strides = [1, 1]} : vector<1x512xf32> to vector<1x16xf32>
    %164 = vector.extract_strided_slice %162 {offsets = [0, 128], sizes = [1, 16], strides = [1, 1]} : vector<1x512xf32> to vector<1x16xf32>
    %165 = vector.extract_strided_slice %158 {offsets = [0, 256], sizes = [1, 16], strides = [1, 1]} : vector<1x512xf32> to vector<1x16xf32>
    %166 = vector.extract_strided_slice %162 {offsets = [0, 384], sizes = [1, 16], strides = [1, 1]} : vector<1x512xf32> to vector<1x16xf32>
    %167 = arith.mulf %164, %151 : vector<1x16xf32>
    %168 = arith.mulf %163, %165 : vector<1x16xf32>
    %169 = arith.addf %167, %168 : vector<1x16xf32>
    %170 = math.tanh %169 : vector<1x16xf32>
    %171 = arith.mulf %166, %170 : vector<1x16xf32>
    %c8_63 = arith.constant 8 : index
    %c0_64 = arith.constant 0 : index
    %172 = vector.load %arg4[%c8_63, %c0_64] : memref<10x16xf32, #tpu.memory_space<vmem>>, vector<1x16xf32>
    tpu.vector_store %arg4[%c8_63, %c0_64], %171 {strides = array<i32>} : memref<10x16xf32, #tpu.memory_space<vmem>>, vector<1x16xf32>,
    %c9 = arith.constant 9 : index
    %c0_65 = arith.constant 0 : index
    %173 = vector.load %arg3[%c9, %c0_65] : memref<10x512xf32, #tpu.memory_space<vmem>>, vector<1x512xf32>
    %cst_66 = arith.constant dense<0.000000e+00> : vector<1x512xf32>
    %174 = tpu.matmul %171, %1, %cst_66 {dimension_numbers = #tpu.dot_dimension_numbers<[1], [0], [0], [1], [0, 0, 1, 1], [], []>} : vector<1x16xf32>, vector<16x512xf32>, vector<1x512xf32> -> vector<1x512xf32>
    %175 = arith.addf %173, %174 : vector<1x512xf32>
    %176 = math.tanh %175 : vector<1x512xf32>
    %cst_67 = arith.constant 5.000000e-01 : f32
    %177 = vector.broadcast %cst_67 : f32 to vector<1x512xf32>
    %178 = arith.mulf %177, %176 : vector<1x512xf32>
    %cst_68 = arith.constant 5.000000e-01 : f32
    %179 = vector.broadcast %cst_68 : f32 to vector<1x512xf32>
    %180 = arith.addf %178, %179 : vector<1x512xf32>
    %181 = vector.extract_strided_slice %180 {offsets = [0, 0], sizes = [1, 16], strides = [1, 1]} : vector<1x512xf32> to vector<1x16xf32>
    %182 = vector.extract_strided_slice %180 {offsets = [0, 128], sizes = [1, 16], strides = [1, 1]} : vector<1x512xf32> to vector<1x16xf32>
    %183 = vector.extract_strided_slice %176 {offsets = [0, 256], sizes = [1, 16], strides = [1, 1]} : vector<1x512xf32> to vector<1x16xf32>
    %184 = vector.extract_strided_slice %180 {offsets = [0, 384], sizes = [1, 16], strides = [1, 1]} : vector<1x512xf32> to vector<1x16xf32>
    %185 = arith.mulf %182, %169 : vector<1x16xf32>
    %186 = arith.mulf %181, %183 : vector<1x16xf32>
    %187 = arith.addf %185, %186 : vector<1x16xf32>
    %188 = math.tanh %187 : vector<1x16xf32>
    %189 = arith.mulf %184, %188 : vector<1x16xf32>
    %c9_69 = arith.constant 9 : index
    %c0_70 = arith.constant 0 : index
    %190 = vector.load %arg4[%c9_69, %c0_70] : memref<10x16xf32, #tpu.memory_space<vmem>>, vector<1x16xf32>
    tpu.vector_store %arg4[%c9_69, %c0_70], %189 {strides = array<i32>} : memref<10x16xf32, #tpu.memory_space<vmem>>, vector<1x16xf32>,
    %c0_71 = arith.constant 0 : index
    %c0_72 = arith.constant 0 : index
    %191 = vector.load %arg4[%c0_71, %c0_72] : memref<10x16xf32, #tpu.memory_space<vmem>>, vector<10x16xf32>
    %cst_73 = arith.constant dense<0.000000e+00> : vector<10x10xf32>
    %192 = tpu.matmul %191, %4, %cst_73 {dimension_numbers = #tpu.dot_dimension_numbers<[1], [1], [0], [0], [0, 0, 1, 0], [], []>} : vector<10x16xf32>, vector<10x16xf32>, vector<10x10xf32> -> vector<10x10xf32>
    %193 = math.exp %192 : vector<10x10xf32>
    %cst_74 = arith.constant dense<0.000000e+00> : vector<10xf32>
    %194 = vector.multi_reduction <add>, %193, %cst_74 [1] : vector<10x10xf32> to vector<10xf32>
    %195 = vector.shape_cast %194 : vector<10xf32> to vector<10x1xf32>
    %196 = arith.mulf %195, %195 : vector<10x1xf32>
    %197 = arith.mulf %196, %196 : vector<10x1xf32>
    %198 = arith.mulf %197, %197 : vector<10x1xf32>
    %199 = arith.mulf %198, %196 : vector<10x1xf32>
    %200 = tpu.reciprocal %199 {approx = true} : vector<10x1xf32> -> vector<10x1xf32>
    %201 = tpu.iota {dimensions = array<i32: 1>} : vector<10x10xi32>
    %c9_i32 = arith.constant 9 : i32
    %202 = vector.broadcast %c9_i32 : i32 to vector<10x10xi32>
    %203 = arith.cmpi eq, %201, %202 : vector<10x10xi32>
    %cst_75 = arith.constant 1.000000e+00 : f32
    %204 = vector.shape_cast %200 : vector<10x1xf32> to vector<10x1xf32>
    %205 = vector.broadcast %204 : vector<10x1xf32> to vector<10x10xf32>
    %206 = vector.broadcast %cst_75 : f32 to vector<10x10xf32>
    %207 = arith.select %203, %205, %206 : vector<10x10xi1>, vector<10x10xf32>
    %208 = arith.mulf %193, %207 : vector<10x10xf32>
    %209 = tpu.iota {dimensions = array<i32: 0>} : vector<10x10xi32>
    %c1_i32 = arith.constant 1 : i32
    %210 = vector.broadcast %c1_i32 : i32 to vector<10x10xi32>
    %211 = arith.cmpi sge, %209, %210 : vector<10x10xi32>
    %212 = vector.extract_strided_slice %208 {offsets = [9, 0], sizes = [1, 10], strides = [1, 1]} : vector<10x10xf32> to vector<1x10xf32>
    %213 = vector.extract_strided_slice %208 {offsets = [0, 0], sizes = [9, 10], strides = [1, 1]} : vector<10x10xf32> to vector<9x10xf32>
    %214 = tpu.concatenate %212, %213 in 0 : vector<1x10xf32>, vector<9x10xf32> -> vector<10x10xf32>
    %cst_76 = arith.constant 1.000000e+00 : f32
    %215 = vector.broadcast %cst_76 : f32 to vector<10x10xf32>
    %216 = arith.select %211, %214, %215 : vector<10x10xi1>, vector<10x10xf32>
    %217 = arith.mulf %208, %216 : vector<10x10xf32>
    %c2_i32 = arith.constant 2 : i32
    %218 = vector.broadcast %c2_i32 : i32 to vector<10x10xi32>
    %219 = arith.cmpi sge, %209, %218 : vector<10x10xi32>
    %220 = vector.extract_strided_slice %217 {offsets = [8, 0], sizes = [2, 10], strides = [1, 1]} : vector<10x10xf32> to vector<2x10xf32>
    %221 = vector.extract_strided_slice %217 {offsets = [0, 0], sizes = [8, 10], strides = [1, 1]} : vector<10x10xf32> to vector<8x10xf32>
    %222 = tpu.concatenate %220, %221 in 0 : vector<2x10xf32>, vector<8x10xf32> -> vector<10x10xf32>
    %cst_77 = arith.constant 1.000000e+00 : f32
    %223 = vector.broadcast %cst_77 : f32 to vector<10x10xf32>
    %224 = arith.select %219, %222, %223 : vector<10x10xi1>, vector<10x10xf32>
    %225 = arith.mulf %217, %224 : vector<10x10xf32>
    %c4_i32 = arith.constant 4 : i32
    %226 = vector.broadcast %c4_i32 : i32 to vector<10x10xi32>
    %227 = arith.cmpi sge, %209, %226 : vector<10x10xi32>
    %228 = vector.extract_strided_slice %225 {offsets = [6, 0], sizes = [4, 10], strides = [1, 1]} : vector<10x10xf32> to vector<4x10xf32>
    %229 = vector.extract_strided_slice %225 {offsets = [0, 0], sizes = [6, 10], strides = [1, 1]} : vector<10x10xf32> to vector<6x10xf32>
    %230 = tpu.concatenate %228, %229 in 0 : vector<4x10xf32>, vector<6x10xf32> -> vector<10x10xf32>
    %cst_78 = arith.constant 1.000000e+00 : f32
    %231 = vector.broadcast %cst_78 : f32 to vector<10x10xf32>
    %232 = arith.select %227, %230, %231 : vector<10x10xi1>, vector<10x10xf32>
    %233 = arith.mulf %225, %232 : vector<10x10xf32>
    %c8_i32 = arith.constant 8 : i32
    %234 = vector.broadcast %c8_i32 : i32 to vector<10x10xi32>
    %235 = arith.cmpi sge, %209, %234 : vector<10x10xi32>
    %236 = vector.extract_strided_slice %233 {offsets = [2, 0], sizes = [8, 10], strides = [1, 1]} : vector<10x10xf32> to vector<8x10xf32>
    %237 = vector.extract_strided_slice %233 {offsets = [0, 0], sizes = [2, 10], strides = [1, 1]} : vector<10x10xf32> to vector<2x10xf32>
    %238 = tpu.concatenate %236, %237 in 0 : vector<8x10xf32>, vector<2x10xf32> -> vector<10x10xf32>
    %cst_79 = arith.constant 1.000000e+00 : f32
    %239 = vector.broadcast %cst_79 : f32 to vector<10x10xf32>
    %240 = arith.select %235, %238, %239 : vector<10x10xi1>, vector<10x10xf32>
    %241 = arith.mulf %233, %240 : vector<10x10xf32>
    %cst_80 = arith.constant dense<0.000000e+00> : vector<10x16xf32>
    %242 = tpu.matmul %241, %4, %cst_80 {dimension_numbers = #tpu.dot_dimension_numbers<[1], [0], [0], [1], [0, 0, 1, 1], [], []>} : vector<10x10xf32>, vector<10x16xf32>, vector<10x16xf32> -> vector<10x16xf32>
    %cst_81 = arith.constant dense<0.000000e+00> : vector<16xf32>
    %243 = vector.multi_reduction <add>, %4, %cst_81 [0] : vector<10x16xf32> to vector<16xf32>
    %244 = vector.shape_cast %243 : vector<16xf32> to vector<1x16xf32>
    %245 = tpu.iota {dimensions = array<i32: 1>} : vector<10x16xi32>
    %c4_i32_82 = arith.constant 4 : i32
    %246 = vector.broadcast %c4_i32_82 : i32 to vector<10x16xi32>
    %247 = arith.cmpi slt, %245, %246 : vector<10x16xi32>
    %248 = vector.shape_cast %244 : vector<1x16xf32> to vector<1x16xf32>
    %249 = vector.broadcast %248 : vector<1x16xf32> to vector<10x16xf32>
    %250 = arith.select %247, %242, %249 : vector<10x16xi1>, vector<10x16xf32>
    %c0_83 = arith.constant 0 : index
    %c0_84 = arith.constant 0 : index
    %251 = vector.load %arg2[%c0_83, %c0_84] : memref<10x32xf32, #tpu.memory_space<vmem>>, vector<10x16xf32>
    tpu.vector_store %arg2[%c0_83, %c0_84], %250 {strides = array<i32>} : memref<10x32xf32, #tpu.memory_space<vmem>>, vector<10x16xf32>,
    %c0_85 = arith.constant 0 : index
    %c16_86 = arith.constant 16 : index
    %252 = vector.load %arg2[%c0_85, %c16_86] : memref<10x32xf32, #tpu.memory_space<vmem>>, vector<10x16xf32>
    tpu.vector_store %arg2[%c0_85, %c16_86], %191 {strides = array<i32>} : memref<10x32xf32, #tpu.memory_space<vmem>>, vector<10x16xf32>,
    return
  }
}

</mosaic_0001>

<bundles_post_ra>
// kernel: attention_forward.1
= control target key start
LH: loop header
LB: loop body
LE: loop exit
PB: predicated region body
PF: predicated region fallthrough
CT: control target
= control target key end

     0   :  { %v2763_v3 = vmov 0.0   ;;  %vm275_vm0 = vcmask 130048   ;;  %vm467_vm1 = vcmask 122880   ;;  %s2765_s22 = smov 16   ;;  %vm2308_vm3 = vcmask 80896   ;;  %s3201_s0 = inlined_call_operand.vmem [shape: f32[145,512], index: 0, kind: input, shape index: {}]   ;;  %s3202_s1 = inlined_call_operand.vmem [shape: f32[34,128], index: 1, kind: input, shape index: {}]   ;;  %s3203_s2 = inlined_call_operand.vmem [shape: f32[10,32], index: 2, kind: output, shape index: {}]  }
   0x1   :  { %v12_v0 = vld [vmem:[%s3201_s0 + $0x8] sm:$0xff]  ;;  %v14_v2 = vld [vmem:[%s3201_s0 + $0x18] sm:$0xff]  ;;  %176 = vmatprep.mubr.f32.mxu0 %v2763_v3  ;;  %253 = vmatprep.mubr.f32.mxu1 %v2763_v3  ;;  %v11_v6 = vld [vmem:[%s3201_s0] sm:$0xff]  ;;  %vm2312_vm4 = vcmask 74752   ;;  %vm2358_vm5 = vcmask 1041408   ;;  %vm2766_vm6 = vmmov 1  }
   0x2   :  { %v16_v1 = vld [vmem:[%s3201_s0 + $0x28] sm:$0xff]  ;;  %v18_v5 = vld [vmem:[%s3201_s0 + $0x38] sm:$0xff]  ;;  %v15_v7 = vld [vmem:[%s3201_s0 + $0x20] sm:$0xff]  ;;  %vm2342_vm9 = vcmask 1040384   ;;  %vm2374_vm12 = vcmask 1043456   ;;  %vm2477_vm14 = vcmask 123904  }
   0x3   :  { %v2555_v4 = vpack.c.bf16 %v16_v1, %v12_v0  ;;  %v2587_v8 = vpack.c.bf16 %v18_v5, %v14_v2  ;;  %v2557_v9 = vpack.c.bf16 %v15_v7, %v11_v6  ;;  %v13_v10 = vld [vmem:[%s3201_s0 + $0x10] sm:$0xff]  ;;  %v20_v12 = vld [vmem:[%s3201_s0 + $0x48] sm:$0xff]  ;;  %v22_v15 = vld [vmem:[%s3201_s0 + $0x58] sm:$0xff] }
   0x4   :  { %v17_v11 = vld [vmem:[%s3201_s0 + $0x30] sm:$0xff]  ;;  %v24_v14 = vld [vmem:[%s3201_s0 + $0x68] sm:$0xff]  ;;  %v26_v16 = vld [vmem:[%s3201_s0 + $0x78] sm:$0xff] }
   0x5   :  { %2556 = vmatprep.subr.bf16.mxu0 %v2555_v4  ;;  %v2589_v13 = vpack.c.bf16 %v17_v11, %v13_v10  ;;  %2588 = vmatprep.subr.bf16.mxu1 %v2587_v8  ;;  %v2559_v17 = vpack.c.bf16 %v24_v14, %v20_v12  ;;  %v2591_v18 = vpack.c.bf16 %v26_v16, %v22_v15  ;;  %v19_v19 = vld [vmem:[%s3201_s0 + $0x40] sm:$0xff]  ;;  %v21_v21 = vld [vmem:[%s3201_s0 + $0x50] sm:$0xff]  ;;  %v28_v24 = vld [vmem:[%s3201_s0 + $0x88] sm:$0xff] }
   0x6   :  { %2558 = vmatpush1.bf16.msra.mxu0 %v2557_v9  ;;  %v23_v20 = vld [vmem:[%s3201_s0 + $0x60] sm:$0xff]  ;;  %v25_v23 = vld [vmem:[%s3201_s0 + $0x70] sm:$0xff]  ;;  %v32_v25 = vld [vmem:[%s3201_s0 + $0xa8] sm:$0xff] }
   0x7   :  { %2590 = vmatpush1.bf16.msra.mxu1 %v2589_v13  ;;  %v2561_v22 = vpack.c.bf16 %v23_v20, %v19_v19  ;;  %2560 = vmatprep.subr.bf16.mxu0 %v2559_v17  ;;  %v2593_v26 = vpack.c.bf16 %v25_v23, %v21_v21  ;;  %v2563_v27 = vpack.c.bf16 %v32_v25, %v28_v24  ;;  %v30_v28 = vld [vmem:[%s3201_s0 + $0x98] sm:$0xff]  ;;  %v27_v30 = vld [vmem:[%s3201_s0 + $0x80] sm:$0xff]  ;;  %v29_v33 = vld [vmem:[%s3201_s0 + $0x90] sm:$0xff] }
   0x8   :  { %2592 = vmatprep.subr.bf16.mxu1 %v2591_v18  ;;  %v34_v29 = vld [vmem:[%s3201_s0 + $0xb8] sm:$0xff]  ;;  %v31_v32 = vld [vmem:[%s3201_s0 + $0xa0] sm:$0xff]  ;;  %v33_v34 = vld [vmem:[%s3201_s0 + $0xb0] sm:$0xff] }
   0x9   :  { %v2595_v31 = vpack.c.bf16 %v34_v29, %v30_v28  ;;  %v2565_v35 = vpack.c.bf16 %v31_v32, %v27_v30  ;;  %v36_v36 = vld [vmem:[%s3201_s0 + $0xc8] sm:$0xff]  ;;  %v38_v38 = vld [vmem:[%s3201_s0 + $0xd8] sm:$0xff]  ;;  %v2597_v39 = vpack.c.bf16 %v33_v34, %v29_v33  ;;  %v35_v42 = vld [vmem:[%s3201_s0 + $0xc0] sm:$0xff] }
   0xa   :  { %2562 = vmatpush1.bf16.msra.mxu0 %v2561_v22  ;;  %v40_v37 = vld [vmem:[%s3201_s0 + $0xe8] sm:$0xff]  ;;  %v42_v41 = vld [vmem:[%s3201_s0 + $0xf8] sm:$0xff]  ;;  %v39_v43 = vld [vmem:[%s3201_s0 + $0xe0] sm:$0xff] }
   0xb   :  { %2594 = vmatpush1.bf16.msra.mxu1 %v2593_v26  ;;  %2564 = vmatprep.subr.bf16.mxu0 %v2563_v27  ;;  %v2567_v40 = vpack.c.bf16 %v40_v37, %v36_v36  ;;  %v2599_v44 = vpack.c.bf16 %v42_v41, %v38_v38  ;;  %v37_v45 = vld [vmem:[%s3201_s0 + $0xd0] sm:$0xff]  ;;  %v44_v47 = vld [vmem:[%s3201_s0 + $0x108] sm:$0xff]  ;;  %v46_v49 = vld [vmem:[%s3201_s0 + $0x118] sm:$0xff]  ;;  %v2569_v51 = vpack.c.bf16 %v39_v43, %v35_v42 }
   0xc   :  { %2596 = vmatprep.subr.bf16.mxu1 %v2595_v31  ;;  %v41_v46 = vld [vmem:[%s3201_s0 + $0xf0] sm:$0xff]  ;;  %v48_v48 = vld [vmem:[%s3201_s0 + $0x128] sm:$0xff]  ;;  %v50_v50 = vld [vmem:[%s3201_s0 + $0x138] sm:$0xff] }
   0xd   :  { %v2601_v52 = vpack.c.bf16 %v41_v46, %v37_v45  ;;  %v2571_v53 = vpack.c.bf16 %v48_v48, %v44_v47  ;;  %v43_v54 = vld [vmem:[%s3201_s0 + $0x100] sm:$0xff]  ;;  %v45_v56 = vld [vmem:[%s3201_s0 + $0x110] sm:$0xff]  ;;  %v2603_v57 = vpack.c.bf16 %v50_v50, %v46_v49  ;;  %v52_v59 = vld [vmem:[%s3201_s0 + $0x148] sm:$0xff]  ;;  %v92_v49 = vlaneseq }
   0xe   :  { %2566 = vmatpush1.bf16.msra.mxu0 %v2565_v35  ;;  %v47_v55 = vld [vmem:[%s3201_s0 + $0x120] sm:$0xff]  ;;  %v49_v58 = vld [vmem:[%s3201_s0 + $0x130] sm:$0xff]  ;;  %v56_v60 = vld [vmem:[%s3201_s0 + $0x168] sm:$0xff] }
   0xf   :  { %2598 = vmatpush1.bf16.msra.mxu1 %v2597_v39  ;;  %2568 = vmatprep.subr.bf16.mxu0 %v2567_v40  ;;  %v54_v61 = vld [vmem:[%s3201_s0 + $0x158] sm:$0xff]  ;;  %v2573_v63 = vpack.c.bf16 %v47_v55, %v43_v54  ;;  %v2605_v0 = vpack.c.bf16 %v49_v58, %v45_v56  ;;  %v2575_v1 = vpack.c.bf16 %v56_v60, %v52_v59  ;;  %v51_v2 = vld [vmem:[%s3201_s0 + $0x140] sm:$0xff]  ;;  %v53_v5 = vld [vmem:[%s3201_s0 + $0x150] sm:$0xff]  ;;  %v3036_v50 = vshrl.u32 %v92_v49, 7 }
  0x10   :  { %2600 = vmatprep.subr.bf16.mxu1 %v2599_v44  ;;  %v58_v62 = vld [vmem:[%s3201_s0 + $0x178] sm:$0xff]  ;;  %v55_v4 = vld [vmem:[%s3201_s0 + $0x160] sm:$0xff]  ;;  %v57_v7 = vld [vmem:[%s3201_s0 + $0x170] sm:$0xff] }
  0x11   :  { %v2607_v6 = vpack.c.bf16 %v58_v62, %v54_v61  ;;  %v60_v8 = vld [vmem:[%s3201_s0 + $0x188] sm:$0xff]  ;;  %v62_v10 = vld [vmem:[%s3201_s0 + $0x198] sm:$0xff]  ;;  %v2577_v12 = vpack.c.bf16 %v55_v4, %v51_v2  ;;  %v2609_v13 = vpack.c.bf16 %v57_v7, %v53_v5  ;;  %v59_v15 = vld [vmem:[%s3201_s0 + $0x180] sm:$0xff]  ;;  %v98_v54 = vsub.s32 1, %v3036_v50 }
  0x12   :  { %2570 = vmatpush1.bf16.msra.mxu0 %v2569_v51  ;;  %v64_v9 = vld [vmem:[%s3201_s0 + $0x1a8] sm:$0xff]  ;;  %v66_v11 = vld [vmem:[%s3201_s0 + $0x1b8] sm:$0xff]  ;;  %v63_v16 = vld [vmem:[%s3201_s0 + $0x1a0] sm:$0xff]  ;;  %v94_v51 = vsub.s32 0, %v3036_v50  ;;  %v106_v55 = vsub.s32 3, %v3036_v50  ;;  %vm2336_vm10 = vcmp.ge.s32.totalorder %v3036_v50, 1 }
  0x13   :  { %2602 = vmatpush1.bf16.msra.mxu1 %v2601_v52  ;;  %2572 = vmatprep.subr.bf16.mxu0 %v2571_v53  ;;  %v2579_v14 = vpack.c.bf16 %v64_v9, %v60_v8  ;;  %v61_v17 = vld [vmem:[%s3201_s0 + $0x190] sm:$0xff]  ;;  %v2611_v18 = vpack.c.bf16 %v66_v11, %v62_v10  ;;  %v68_v20 = vld [vmem:[%s3201_s0 + $0x1c8] sm:$0xff]  ;;  %v70_v22 = vld [vmem:[%s3201_s0 + $0x1d8] sm:$0xff]  ;;  %v2581_v24 = vpack.c.bf16 %v63_v16, %v59_v15  ;;  %v102_v53 = vsub.s32 2, %v3036_v50 }
  0x14   :  { %2604 = vmatprep.subr.bf16.mxu1 %v2603_v57  ;;  %v65_v19 = vld [vmem:[%s3201_s0 + $0x1b0] sm:$0xff]  ;;  %v72_v21 = vld [vmem:[%s3201_s0 + $0x1e8] sm:$0xff]  ;;  %v74_v23 = vld [vmem:[%s3201_s0 + $0x1f8] sm:$0xff]  ;;  %v2764_v61 = vmov 1966171168   ;;  %vm2353_vm11 = vcmp.ge.s32.totalorder %v3036_v50, 2 }
  0x15   :  { %v2613_v25 = vpack.c.bf16 %v65_v19, %v61_v17  ;;  %v2583_v26 = vpack.c.bf16 %v72_v21, %v68_v20  ;;  %v67_v27 = vld [vmem:[%s3201_s0 + $0x1c0] sm:$0xff]  ;;  %v69_v29 = vld [vmem:[%s3201_s0 + $0x1d0] sm:$0xff]  ;;  %v2615_v30 = vpack.c.bf16 %v74_v23, %v70_v22  ;;  %v76_v32 = vld [vmem:[%s3201_s0 + $0x208] sm:$0xff]  ;;  %v428_v62 = vunpack.c.l.s4 %v2764_v61 }
  0x16   :  { %2574 = vmatpush1.bf16.msra.mxu0 %v2573_v63  ;;  %v71_v28 = vld [vmem:[%s3201_s0 + $0x1e0] sm:$0xff]  ;;  %v73_v31 = vld [vmem:[%s3201_s0 + $0x1f0] sm:$0xff]  ;;  %v80_v33 = vld [vmem:[%s3201_s0 + $0x228] sm:$0xff]  ;;  %vm2364_vm13 = vcmp.ge.s32.totalorder %v3036_v50, 4 }
  0x17   :  { %2606 = vmatpush1.bf16.msra.mxu1 %v2605_v0  ;;  %2576 = vmatprep.subr.bf16.mxu0 %v2575_v1  ;;  %v78_v34 = vld [vmem:[%s3201_s0 + $0x218] sm:$0xff]  ;;  %v2585_v36 = vpack.c.bf16 %v71_v28, %v67_v27  ;;  %v2617_v37 = vpack.c.bf16 %v73_v31, %v69_v29  ;;  %v2988_v38 = vpack.c.bf16 %v80_v33, %v76_v32  ;;  %v75_v39 = vld [vmem:[%s3201_s0 + $0x200] sm:$0xff]  ;;  %v77_v42 = vld [vmem:[%s3201_s0 + $0x210] sm:$0xff]  ;;  %v429_v7 = vunpack.c.0.s8 %v428_v62 }
  0x18   :  { %2608 = vmatprep.subr.bf16.mxu1 %v2607_v6  ;;  %v82_v35 = vld [vmem:[%s3201_s0 + $0x238] sm:$0xff]  ;;  %v79_v40 = vld [vmem:[%s3201_s0 + $0x220] sm:$0xff]  ;;  %v81_v43 = vld [vmem:[%s3201_s0 + $0x230] sm:$0xff] }
  0x19   :  { %v2996_v41 = vpack.c.bf16 %v82_v35, %v78_v34  ;;  %v85_v44 = vld [vmem:[%s3202_s1] sm:$0xff]  ;;  %v3007_v45 = vpack.c.bf16 %v79_v40, %v75_v39  ;;  %v3010_v46 = vpack.c.bf16 %v81_v43, %v77_v42  ;;  %v86_v47 = vld [vmem:[%s3202_s1 + $0x8] sm:$0x3]  ;;  %v3046_v16 = vsub.s32 %v429_v7, %v3036_v50  ;;  %vm2700_vm2 = vmpackc.low %vm275_vm0, %vm275_vm0 }
  0x1a   :  { %2578 = vmatpush1.bf16.msra.mxu0 %v2577_v12  ;;  %v89_v48 = vld [vmem:[%s3202_s1 + $0x20] sm:$0x1]  ;;  %v90_v32 = vld [vmem:[%s3202_s1 + $0x21] sm:$0x1]  ;;  %vm2706_vm7 = vmpackc.low %vm2358_vm5, %vm2766_vm6 }
  0x1b   :  { %2610 = vmatpush1.bf16.msra.mxu1 %v2609_v13  ;;  %2580 = vmatprep.subr.bf16.mxu0 %v2579_v14  ;;  %v2505_v52 = vld [vmem:[%s3201_s0 + $0x240] ss:$8 sm:$0xf] }
  0x1c   :  { %2612 = vmatprep.subr.bf16.mxu1 %v2611_v18  ;;  %v95_v56 = vrot.slane %v2505_v52, %v94_v51  ;;  %v103_v57 = vrot.slane %v2505_v52, %v102_v53  ;;  %v99_v58 = vrot.slane %v2505_v52, %v98_v54  ;;  %v107_v59 = vrot.slane %v2505_v52, %v106_v55 }
  0x1e   :  { %2582 = vmatpush1.bf16.msra.mxu0 %v2581_v24 }
  0x1f   :  { %2614 = vmatpush1.bf16.msra.mxu1 %v2613_v25  ;;  %2584 = vmatprep.subr.bf16.mxu0 %v2583_v26 }
  0x20   :  { %2616 = vmatprep.subr.bf16.mxu1 %v2615_v30 }
  0x22   :  { %2586 = vmatpush1.bf16.msra.mxu0 %v2585_v36 }
  0x23   :  { %2618 = vmatpush1.bf16.msra.mxu1 %v2617_v37  ;;  %2620 = vmatprep.subr.bf16.mxu0 %v2988_v38 }
  0x24   :  { %2624 = vmatprep.subr.bf16.mxu1 %v2996_v41 }
  0x25   :  { %177 = vmatmul.mubr.f32.vlgmr.msra.gmra.mrb[0].mxu0 %v85_v44 }
  0x26   :  { %254 = vmatmul.mubr.f32.vlgmr.msra.gmra.mrb[0].mxu1 %v85_v44  ;;  %2622 = vmatpush1.bf16.msra.mxu0 %v3007_v45 }
  0x27   :  { %2626 = vmatpush1.bf16.msra.mxu1 %v3010_v46  ;;  %182 = vmatprep.mubr.f32.mxu0 %v2763_v3 }
  0x28   :  { %259 = vmatprep.mubr.f32.mxu1 %v2763_v3  ;;  %2628 = vmatprep.subr.bf16.mxu0 %v2988_v38 }
  0x29   :  { %183 = vmatmul.mubr.f32.gmra.mrb[2].mxu0 %v86_v47  ;;  %2632 = vmatprep.subr.bf16.mxu1 %v2996_v41 }
  0x2a   :  { %260 = vmatmul.mubr.f32.gmra.mrb[2].mxu1 %v86_v47  ;;  %343 = vmatprep.mubr.f32.mxu0 %v2763_v3 }
  0x2b   :  { %414 = vmatprep.mubr.f32.mxu1 %v2763_v3 }
  0x2d   :  { %2506 = vmatmul.mubr.msk.f32.vlgmr.msra.gmra.mrb[4].mxu0 %vm275_vm0, %v89_v48 }
  0x2e   :  { %2507 = vmatmul.mubr.msk.f32.vlgmr.msra.gmra.mrb[4].mxu1 %vm275_vm0, %v89_v48  ;;  %2630 = vmatpush1.bf16.msra.mxu0 %v3007_v45 }
  0x2f   :  { %2634 = vmatpush1.bf16.msra.mxu1 %v3010_v46  ;;  %538 = vmatprep.mubr.f32.mxu0 %v2763_v3 }
  0x30   :  { %609 = vmatprep.mubr.f32.mxu1 %v2763_v3  ;;  %2636 = vmatprep.subr.bf16.mxu0 %v2988_v38 }
  0x31   :  { %2640 = vmatprep.subr.bf16.mxu1 %v2996_v41 }
  0xf8   :  { %v178_v60 = vpop.f32.mrb[0].mxu0 }
  0xf9   :  { %v179_v63 = vadd.f32 %v178_v60, %v95_v56  ;;  %v255_v0 = vpop.f32.mrb[0].mxu1  ;;  %v180_v1 = vpop.f32.mrb[1].mxu0 }
  0xfa   :  { %v256_v2 = vadd.f32 %v255_v0, %v103_v57  ;;  %v181_v4 = vadd.f32 %v180_v1, %v99_v58  ;;  %v257_v5 = vpop.f32.mrb[1].mxu1 }
  0xfb   :  { %266 = vst [vmem:[#allocation2] sm:$0xff] %v179_v63  ;;  %v258_v6 = vadd.f32 %v257_v5, %v107_v59 }
  0xfc   :  { %268 = vst [vmem:[#allocation2 + $0x10] sm:$0xff] %v256_v2  ;;  %267 = vst [vmem:[#allocation2 + $0x8] sm:$0xff] %v181_v4  ;;  %v184_v8 = vpop.f32.mrb[2].mxu0 }
  0xfd   :  { %269 = vst [vmem:[#allocation2 + $0x18] sm:$0xff] %v258_v6  ;;  %v185_v9 = vadd.f32 %v184_v8, %v95_v56  ;;  %v261_v10 = vpop.f32.mrb[2].mxu1  ;;  %v186_v11 = vpop.f32.mrb[3].mxu0 }
  0xfe   :  { %v262_v12 = vadd.f32 %v261_v10, %v103_v57  ;;  %v187_v13 = vadd.f32 %v186_v11, %v99_v58  ;;  %v263_v14 = vpop.f32.mrb[3].mxu1 }
  0xff   :  { %270 = vst [vmem:[#allocation2 + $0x20] sm:$0x3] %v185_v9  ;;  %v264_v15 = vadd.f32 %v263_v14, %v107_v59 }
 0x100   :  { %272 = vst [vmem:[#allocation2 + $0x30] sm:$0x3] %v262_v12  ;;  %271 = vst [vmem:[#allocation2 + $0x28] sm:$0x3] %v187_v13  ;;  %v345_v17 = vpop.f32.mrb[4].mxu0 }
 0x101   :  { %273 = vst [vmem:[#allocation2 + $0x38] sm:$0x3] %v264_v15  ;;  %v416_v18 = vpop.f32.mrb[4].mxu1  ;;  %v347_v19 = vpop.f32.mrb[5].mxu0 }
 0x102   :  { %v425_v20 = vcombine.low %v345_v17, %v347_v19  ;;  %v418_v21 = vpop.f32.mrb[5].mxu1 }
 0x103   :  { %v426_v22 = vcombine.low %v416_v18, %v418_v21 }
 0x104   :  { %v433_v23 = vrot.slane %v425_v20, %v3046_v16  ;;  %v274_v27 = vld [vmem:[#allocation2] ss:$8 sm:$0xf]  ;;  %v470_v57 = vld [vmem:[#allocation2 + $0x1] ss:$8 sm:$0xf] }
 0x105   :  { %v440_v24 = vrot.slane %v426_v22, %v3046_v16  ;;  %v664_v18 = vld [vmem:[#allocation2 + $0x2] ss:$8 sm:$0xf] }
 0x107   :  { %v441_v25 = vcombine.low %v433_v23, %v440_v24 }
 0x109   :  { %v448_v26 = vrot.slane %v441_v25, %v3046_v16 }
 0x10b   :  { %v450_v28 = vadd.f32 %v448_v26, %v274_v27 }
 0x10d   :  { %2715 = vtanh.f32 %v450_v28 }
 0x117   :  { %v2716_v29 = vpop.eup %2715 }
 0x118   :  { %v452_v30 = vmul.f32 0.5, %v2716_v29  ;;  %v459_v33 = vrot.slane %v2716_v29, 2 }
 0x11a   :  { %v453_v31 = vadd.f32 0.5, %v452_v30 }
 0x11c   :  { %v455_v34 = vrot.slane %v453_v31, 1  ;;  %v461_v36 = vmul.f32 %v459_v33, %v453_v31  ;;  %v464_v39 = vrot.slane %v453_v31, 3 }
 0x11e   :  { %v457_v35 = vmul.f32 %v455_v34, %v90_v32 }
 0x120   :  { %v462_v37 = vadd.f32 %v461_v36, %v457_v35 }
 0x122   :  { %2717 = vtanh.f32 %v462_v37 }
 0x12c   :  { %v2718_v40 = vpop.eup %2717 }
 0x12d   :  { %v466_v42 = vmul.f32 %v2718_v40, %v464_v39 }
 0x12f   :  { %468 = vst.msk [vmem:[#allocation3] sm:$0x1] %vm467_vm1, %v466_v42  ;;  %2508 = vmatmul.mubr.msk.f32.vlgmr.msra.gmra.mrb[6].mxu0 %vm275_vm0, %v466_v42  ;;  %2509 = vmatmul.mubr.msk.f32.vlgmr.msra.gmra.mrb[6].mxu1 %vm275_vm0, %v466_v42 }
 0x130   :  { %2638 = vmatpush1.bf16.msra.mxu0 %v3007_v45  ;;  %2642 = vmatpush1.bf16.msra.mxu1 %v3010_v46 }
 0x131   :  { %732 = vmatprep.mubr.f32.mxu0 %v2763_v3  ;;  %803 = vmatprep.mubr.f32.mxu1 %v2763_v3 }
 0x132   :  { %2644 = vmatprep.subr.bf16.mxu0 %v2988_v38  ;;  %2648 = vmatprep.subr.bf16.mxu1 %v2996_v41 }
 0x202   :  { %v540_v43 = vpop.f32.mrb[6].mxu0  ;;  %v611_v44 = vpop.f32.mrb[6].mxu1 }
 0x203   :  { %v542_v47 = vpop.f32.mrb[7].mxu0  ;;  %v613_v48 = vpop.f32.mrb[7].mxu1 }
 0x204   :  { %v620_v51 = vcombine.low %v540_v43, %v542_v47  ;;  %v621_v52 = vcombine.low %v611_v44, %v613_v48  ;;  %v858_v43 = vld [vmem:[#allocation2 + $0x3] ss:$8 sm:$0xf] }
 0x206   :  { %v628_v53 = vrot.slane %v620_v51, %v3046_v16  ;;  %v635_v54 = vrot.slane %v621_v52, %v3046_v16 }
 0x208   :  { %v636_v55 = vcombine.low %v628_v53, %v635_v54 }
 0x20a   :  { %v643_v56 = vrot.slane %v636_v55, %v3046_v16 }
 0x20c   :  { %v645_v58 = vadd.f32 %v643_v56, %v470_v57 }
 0x20e   :  { %2719 = vtanh.f32 %v645_v58 }
 0x218   :  { %v2720_v59 = vpop.eup %2719 }
 0x219   :  { %v647_v60 = vmul.f32 0.5, %v2720_v59  ;;  %v654_v62 = vrot.slane %v2720_v59, 2 }
 0x21b   :  { %v648_v61 = vadd.f32 0.5, %v647_v60 }
 0x21d   :  { %v650_v63 = vrot.slane %v648_v61, 1  ;;  %v656_v1 = vmul.f32 %v654_v62, %v648_v61  ;;  %v659_v4 = vrot.slane %v648_v61, 3 }
 0x21f   :  { %v652_v0 = vmul.f32 %v650_v63, %v462_v37 }
 0x221   :  { %v657_v2 = vadd.f32 %v656_v1, %v652_v0 }
 0x223   :  { %2721 = vtanh.f32 %v657_v2 }
 0x22d   :  { %v2722_v5 = vpop.eup %2721 }
 0x22e   :  { %v661_v6 = vmul.f32 %v2722_v5, %v659_v4 }
 0x230   :  { %662 = vst.msk [vmem:[#allocation3 + $0x1] sm:$0x1] %vm467_vm1, %v661_v6  ;;  %2510 = vmatmul.mubr.msk.f32.vlgmr.msra.gmra.mrb[8].mxu0 %vm275_vm0, %v661_v6  ;;  %2511 = vmatmul.mubr.msk.f32.vlgmr.msra.gmra.mrb[8].mxu1 %vm275_vm0, %v661_v6 }
 0x231   :  { %2646 = vmatpush1.bf16.msra.mxu0 %v3007_v45  ;;  %2650 = vmatpush1.bf16.msra.mxu1 %v3010_v46 }
 0x232   :  { %926 = vmatprep.mubr.f32.mxu0 %v2763_v3  ;;  %997 = vmatprep.mubr.f32.mxu1 %v2763_v3 }
 0x233   :  { %2652 = vmatprep.subr.bf16.mxu0 %v2988_v38  ;;  %2656 = vmatprep.subr.bf16.mxu1 %v2996_v41 }
 0x303   :  { %v734_v7 = vpop.f32.mrb[8].mxu0  ;;  %v805_v8 = vpop.f32.mrb[8].mxu1 }
 0x304   :  { %v736_v9 = vpop.f32.mrb[9].mxu0  ;;  %v807_v10 = vpop.f32.mrb[9].mxu1 }
 0x305   :  { %v814_v11 = vcombine.low %v734_v7, %v736_v9  ;;  %v815_v12 = vcombine.low %v805_v8, %v807_v10  ;;  %v1052_v7 = vld [vmem:[#allocation2 + $0x4] ss:$8 sm:$0xf] }
 0x307   :  { %v822_v13 = vrot.slane %v814_v11, %v3046_v16  ;;  %v829_v14 = vrot.slane %v815_v12, %v3046_v16 }
 0x309   :  { %v830_v15 = vcombine.low %v822_v13, %v829_v14 }
 0x30b   :  { %v837_v17 = vrot.slane %v830_v15, %v3046_v16 }
 0x30d   :  { %v839_v19 = vadd.f32 %v837_v17, %v664_v18 }
 0x30f   :  { %2723 = vtanh.f32 %v839_v19 }
 0x319   :  { %v2724_v20 = vpop.eup %2723 }
 0x31a   :  { %v841_v21 = vmul.f32 0.5, %v2724_v20  ;;  %v848_v23 = vrot.slane %v2724_v20, 2 }
 0x31c   :  { %v842_v22 = vadd.f32 0.5, %v841_v21 }
 0x31e   :  { %v844_v24 = vrot.slane %v842_v22, 1  ;;  %v850_v26 = vmul.f32 %v848_v23, %v842_v22  ;;  %v853_v28 = vrot.slane %v842_v22, 3 }
 0x320   :  { %v846_v25 = vmul.f32 %v844_v24, %v657_v2 }
 0x322   :  { %v851_v27 = vadd.f32 %v850_v26, %v846_v25 }
 0x324   :  { %2725 = vtanh.f32 %v851_v27 }
 0x32e   :  { %v2726_v29 = vpop.eup %2725 }
 0x32f   :  { %v855_v30 = vmul.f32 %v2726_v29, %v853_v28 }
 0x331   :  { %856 = vst.msk [vmem:[#allocation3 + $0x2] sm:$0x1] %vm467_vm1, %v855_v30  ;;  %2512 = vmatmul.mubr.msk.f32.vlgmr.msra.gmra.mrb[10].mxu0 %vm275_vm0, %v855_v30  ;;  %2513 = vmatmul.mubr.msk.f32.vlgmr.msra.gmra.mrb[10].mxu1 %vm275_vm0, %v855_v30 }
 0x332   :  { %2654 = vmatpush1.bf16.msra.mxu0 %v3007_v45  ;;  %2658 = vmatpush1.bf16.msra.mxu1 %v3010_v46 }
 0x333   :  { %1120 = vmatprep.mubr.f32.mxu0 %v2763_v3  ;;  %1191 = vmatprep.mubr.f32.mxu1 %v2763_v3 }
 0x334   :  { %2660 = vmatprep.subr.bf16.mxu0 %v2988_v38  ;;  %2664 = vmatprep.subr.bf16.mxu1 %v2996_v41 }
 0x404   :  { %v928_v31 = vpop.f32.mrb[10].mxu0  ;;  %v999_v32 = vpop.f32.mrb[10].mxu1 }
 0x405   :  { %v930_v33 = vpop.f32.mrb[11].mxu0  ;;  %v1001_v34 = vpop.f32.mrb[11].mxu1 }
 0x406   :  { %v1008_v35 = vcombine.low %v928_v31, %v930_v33  ;;  %v1009_v36 = vcombine.low %v999_v32, %v1001_v34  ;;  %v1246_v31 = vld [vmem:[#allocation2 + $0x5] ss:$8 sm:$0xf] }
 0x408   :  { %v1016_v37 = vrot.slane %v1008_v35, %v3046_v16  ;;  %v1023_v39 = vrot.slane %v1009_v36, %v3046_v16 }
 0x40a   :  { %v1024_v40 = vcombine.low %v1016_v37, %v1023_v39 }
 0x40c   :  { %v1031_v42 = vrot.slane %v1024_v40, %v3046_v16 }
 0x40e   :  { %v1033_v44 = vadd.f32 %v1031_v42, %v858_v43 }
 0x410   :  { %2727 = vtanh.f32 %v1033_v44 }
 0x41a   :  { %v2728_v47 = vpop.eup %2727 }
 0x41b   :  { %v1035_v48 = vmul.f32 0.5, %v2728_v47  ;;  %v1042_v52 = vrot.slane %v2728_v47, 2 }
 0x41d   :  { %v1036_v51 = vadd.f32 0.5, %v1035_v48 }
 0x41f   :  { %v1038_v53 = vrot.slane %v1036_v51, 1  ;;  %v1044_v55 = vmul.f32 %v1042_v52, %v1036_v51  ;;  %v1047_v57 = vrot.slane %v1036_v51, 3 }
 0x421   :  { %v1040_v54 = vmul.f32 %v1038_v53, %v851_v27 }
 0x423   :  { %v1045_v56 = vadd.f32 %v1044_v55, %v1040_v54 }
 0x425   :  { %2729 = vtanh.f32 %v1045_v56 }
 0x42f   :  { %v2730_v58 = vpop.eup %2729 }
 0x430   :  { %v1049_v59 = vmul.f32 %v2730_v58, %v1047_v57 }
 0x432   :  { %1050 = vst.msk [vmem:[#allocation3 + $0x3] sm:$0x1] %vm467_vm1, %v1049_v59  ;;  %2514 = vmatmul.mubr.msk.f32.vlgmr.msra.gmra.mrb[12].mxu0 %vm275_vm0, %v1049_v59  ;;  %2515 = vmatmul.mubr.msk.f32.vlgmr.msra.gmra.mrb[12].mxu1 %vm275_vm0, %v1049_v59 }
 0x433   :  { %2662 = vmatpush1.bf16.msra.mxu0 %v3007_v45  ;;  %2666 = vmatpush1.bf16.msra.mxu1 %v3010_v46 }
 0x434   :  { %1314 = vmatprep.mubr.f32.mxu0 %v2763_v3  ;;  %1385 = vmatprep.mubr.f32.mxu1 %v2763_v3 }
 0x435   :  { %2668 = vmatprep.subr.bf16.mxu0 %v2988_v38  ;;  %2672 = vmatprep.subr.bf16.mxu1 %v2996_v41 }
 0x505   :  { %v1122_v60 = vpop.f32.mrb[12].mxu0  ;;  %v1193_v61 = vpop.f32.mrb[12].mxu1 }
 0x506   :  { %v1124_v62 = vpop.f32.mrb[13].mxu0  ;;  %v1195_v63 = vpop.f32.mrb[13].mxu1 }
 0x507   :  { %v1202_v0 = vcombine.low %v1122_v60, %v1124_v62  ;;  %v1203_v1 = vcombine.low %v1193_v61, %v1195_v63  ;;  %v1440_v60 = vld [vmem:[#allocation2 + $0x6] ss:$8 sm:$0xf] }
 0x509   :  { %v1210_v2 = vrot.slane %v1202_v0, %v3046_v16  ;;  %v1217_v4 = vrot.slane %v1203_v1, %v3046_v16 }
 0x50b   :  { %v1218_v5 = vcombine.low %v1210_v2, %v1217_v4 }
 0x50d   :  { %v1225_v6 = vrot.slane %v1218_v5, %v3046_v16 }
 0x50f   :  { %v1227_v8 = vadd.f32 %v1225_v6, %v1052_v7 }
 0x511   :  { %2731 = vtanh.f32 %v1227_v8 }
 0x51b   :  { %v2732_v9 = vpop.eup %2731 }
 0x51c   :  { %v1229_v10 = vmul.f32 0.5, %v2732_v9  ;;  %v1236_v12 = vrot.slane %v2732_v9, 2 }
 0x51e   :  { %v1230_v11 = vadd.f32 0.5, %v1229_v10 }
 0x520   :  { %v1232_v13 = vrot.slane %v1230_v11, 1  ;;  %v1238_v15 = vmul.f32 %v1236_v12, %v1230_v11  ;;  %v1241_v18 = vrot.slane %v1230_v11, 3 }
 0x522   :  { %v1234_v14 = vmul.f32 %v1232_v13, %v1045_v56 }
 0x524   :  { %v1239_v17 = vadd.f32 %v1238_v15, %v1234_v14 }
 0x526   :  { %2733 = vtanh.f32 %v1239_v17 }
 0x530   :  { %v2734_v19 = vpop.eup %2733 }
 0x531   :  { %v1243_v20 = vmul.f32 %v2734_v19, %v1241_v18 }
 0x533   :  { %1244 = vst.msk [vmem:[#allocation3 + $0x4] sm:$0x1] %vm467_vm1, %v1243_v20  ;;  %2516 = vmatmul.mubr.msk.f32.vlgmr.msra.gmra.mrb[14].mxu0 %vm275_vm0, %v1243_v20  ;;  %2517 = vmatmul.mubr.msk.f32.vlgmr.msra.gmra.mrb[14].mxu1 %vm275_vm0, %v1243_v20 }
 0x534   :  { %2670 = vmatpush1.bf16.msra.mxu0 %v3007_v45  ;;  %2674 = vmatpush1.bf16.msra.mxu1 %v3010_v46 }
 0x535   :  { %1508 = vmatprep.mubr.f32.mxu0 %v2763_v3  ;;  %1579 = vmatprep.mubr.f32.mxu1 %v2763_v3 }
 0x536   :  { %2676 = vmatprep.subr.bf16.mxu0 %v2988_v38  ;;  %2680 = vmatprep.subr.bf16.mxu1 %v2996_v41 }
 0x606   :  { %v1316_v21 = vpop.f32.mrb[14].mxu0  ;;  %v1387_v22 = vpop.f32.mrb[14].mxu1 }
 0x607   :  { %v1318_v23 = vpop.f32.mrb[15].mxu0  ;;  %v1389_v24 = vpop.f32.mrb[15].mxu1 }
 0x608   :  { %v1396_v25 = vcombine.low %v1316_v21, %v1318_v23  ;;  %v1397_v26 = vcombine.low %v1387_v22, %v1389_v24  ;;  %v1634_v21 = vld [vmem:[#allocation2 + $0x7] ss:$8 sm:$0xf] }
 0x60a   :  { %v1404_v27 = vrot.slane %v1396_v25, %v3046_v16  ;;  %v1411_v28 = vrot.slane %v1397_v26, %v3046_v16 }
 0x60c   :  { %v1412_v29 = vcombine.low %v1404_v27, %v1411_v28 }
 0x60e   :  { %v1419_v30 = vrot.slane %v1412_v29, %v3046_v16 }
 0x610   :  { %v1421_v32 = vadd.f32 %v1419_v30, %v1246_v31 }
 0x612   :  { %2735 = vtanh.f32 %v1421_v32 }
 0x61c   :  { %v2736_v33 = vpop.eup %2735 }
 0x61d   :  { %v1423_v34 = vmul.f32 0.5, %v2736_v33  ;;  %v1430_v36 = vrot.slane %v2736_v33, 2 }
 0x61f   :  { %v1424_v35 = vadd.f32 0.5, %v1423_v34 }
 0x621   :  { %v1426_v37 = vrot.slane %v1424_v35, 1  ;;  %v1432_v40 = vmul.f32 %v1430_v36, %v1424_v35  ;;  %v1435_v43 = vrot.slane %v1424_v35, 3 }
 0x623   :  { %v1428_v39 = vmul.f32 %v1426_v37, %v1239_v17 }
 0x625   :  { %v1433_v42 = vadd.f32 %v1432_v40, %v1428_v39 }
 0x627   :  { %2737 = vtanh.f32 %v1433_v42 }
 0x631   :  { %v2738_v44 = vpop.eup %2737 }
 0x632   :  { %v1437_v47 = vmul.f32 %v2738_v44, %v1435_v43  ;;  %v1828_v43 = vld [vmem:[#allocation2 + $0x20] ss:$8 sm:$0xf] }
 0x634   :  { %1438 = vst.msk [vmem:[#allocation3 + $0x5] sm:$0x1] %vm467_vm1, %v1437_v47  ;;  %2518 = vmatmul.mubr.msk.f32.vlgmr.msra.gmra.mrb[16].mxu0 %vm275_vm0, %v1437_v47  ;;  %2519 = vmatmul.mubr.msk.f32.vlgmr.msra.gmra.mrb[16].mxu1 %vm275_vm0, %v1437_v47 }
 0x635   :  { %2678 = vmatpush1.bf16.msra.mxu0 %v3007_v45  ;;  %2682 = vmatpush1.bf16.msra.mxu1 %v3010_v46 }
 0x636   :  { %1702 = vmatprep.mubr.f32.mxu0 %v2763_v3  ;;  %1773 = vmatprep.mubr.f32.mxu1 %v2763_v3 }
 0x637   :  { %2684 = vmatprep.subr.bf16.mxu0 %v2988_v38  ;;  %2688 = vmatprep.subr.bf16.mxu1 %v2996_v41 }
 0x707   :  { %v1510_v48 = vpop.f32.mrb[16].mxu0  ;;  %v1581_v51 = vpop.f32.mrb[16].mxu1 }
 0x708   :  { %v1512_v52 = vpop.f32.mrb[17].mxu0  ;;  %v1583_v53 = vpop.f32.mrb[17].mxu1 }
 0x709   :  { %v1590_v54 = vcombine.low %v1510_v48, %v1512_v52  ;;  %v1591_v55 = vcombine.low %v1581_v51, %v1583_v53 }
 0x70b   :  { %v1598_v56 = vrot.slane %v1590_v54, %v3046_v16  ;;  %v1605_v57 = vrot.slane %v1591_v55, %v3046_v16 }
 0x70d   :  { %v1606_v58 = vcombine.low %v1598_v56, %v1605_v57 }
 0x70f   :  { %v1613_v59 = vrot.slane %v1606_v58, %v3046_v16 }
 0x711   :  { %v1615_v61 = vadd.f32 %v1613_v59, %v1440_v60  ;;  %v3156_v59 = vld [vmem:[%s3202_s1 + $0x10] sm:$0xff]  ;;  %v3161_v60 = vld [vmem:[%s3202_s1 + $0x18] sm:$0x3] }
 0x713   :  { %2739 = vtanh.f32 %v1615_v61  ;;  %v2699_v61 = vpack.c.bf16 %v3161_v60, %v3156_v59 }
 0x71d   :  { %v2740_v62 = vpop.eup %2739 }
 0x71e   :  { %v1617_v63 = vmul.f32 0.5, %v2740_v62  ;;  %v1624_v1 = vrot.slane %v2740_v62, 2 }
 0x720   :  { %v1618_v0 = vadd.f32 0.5, %v1617_v63 }
 0x722   :  { %v1620_v2 = vrot.slane %v1618_v0, 1  ;;  %v1626_v5 = vmul.f32 %v1624_v1, %v1618_v0  ;;  %v1629_v7 = vrot.slane %v1618_v0, 3 }
 0x724   :  { %v1622_v4 = vmul.f32 %v1620_v2, %v1433_v42 }
 0x726   :  { %v1627_v6 = vadd.f32 %v1626_v5, %v1622_v4 }
 0x728   :  { %2741 = vtanh.f32 %v1627_v6 }
 0x732   :  { %v2742_v8 = vpop.eup %2741 }
 0x733   :  { %v1631_v9 = vmul.f32 %v2742_v8, %v1629_v7 }
 0x735   :  { %1632 = vst.msk [vmem:[#allocation3 + $0x6] sm:$0x1] %vm467_vm1, %v1631_v9  ;;  %2520 = vmatmul.mubr.msk.f32.vlgmr.msra.gmra.mrb[18].mxu0 %vm275_vm0, %v1631_v9  ;;  %2521 = vmatmul.mubr.msk.f32.vlgmr.msra.gmra.mrb[18].mxu1 %vm275_vm0, %v1631_v9  ;;  %v2022_v9 = vld [vmem:[#allocation2 + $0x21] ss:$8 sm:$0xf] }
 0x736   :  { %2686 = vmatpush1.bf16.msra.mxu0 %v3007_v45  ;;  %2690 = vmatpush1.bf16.msra.mxu1 %v3010_v46 }
 0x737   :  { %1896 = vmatprep.mubr.f32.mxu0 %v2763_v3  ;;  %1967 = vmatprep.mubr.f32.mxu1 %v2763_v3 }
 0x738   :  { %2692 = vmatprep.subr.bf16.mxu0 %v2988_v38  ;;  %2696 = vmatprep.subr.bf16.mxu1 %v2996_v41 }
 0x808   :  { %v1704_v10 = vpop.f32.mrb[18].mxu0  ;;  %v1775_v11 = vpop.f32.mrb[18].mxu1 }
 0x809   :  { %v1706_v12 = vpop.f32.mrb[19].mxu0  ;;  %v1777_v13 = vpop.f32.mrb[19].mxu1 }
 0x80a   :  { %v1784_v14 = vcombine.low %v1704_v10, %v1706_v12  ;;  %v1785_v15 = vcombine.low %v1775_v11, %v1777_v13 }
 0x80c   :  { %v1792_v17 = vrot.slane %v1784_v14, %v3046_v16  ;;  %v1799_v18 = vrot.slane %v1785_v15, %v3046_v16 }
 0x80e   :  { %v1800_v19 = vcombine.low %v1792_v17, %v1799_v18 }
 0x810   :  { %v1807_v20 = vrot.slane %v1800_v19, %v3046_v16 }
 0x812   :  { %v1809_v22 = vadd.f32 %v1807_v20, %v1634_v21 }
 0x814   :  { %2743 = vtanh.f32 %v1809_v22 }
 0x81e   :  { %v2744_v23 = vpop.eup %2743 }
 0x81f   :  { %v1811_v38 = vmul.f32 0.5, %v2744_v23  ;;  %v1818_v41 = vrot.slane %v2744_v23, 2 }
 0x821   :  { %v1812_v24 = vadd.f32 0.5, %v1811_v38 }
 0x823   :  { %v1814_v25 = vrot.slane %v1812_v24, 1  ;;  %v1820_v27 = vmul.f32 %v1818_v41, %v1812_v24  ;;  %v1823_v29 = vrot.slane %v1812_v24, 3 }
 0x825   :  { %v1816_v26 = vmul.f32 %v1814_v25, %v1627_v6 }
 0x827   :  { %v1821_v28 = vadd.f32 %v1820_v27, %v1816_v26 }
 0x829   :  { %2745 = vtanh.f32 %v1821_v28 }
 0x833   :  { %v2746_v30 = vpop.eup %2745 }
 0x834   :  { %v1825_v31 = vmul.f32 %v2746_v30, %v1823_v29 }
 0x836   :  { %1826 = vst.msk [vmem:[#allocation3 + $0x7] sm:$0x1] %vm467_vm1, %v1825_v31  ;;  %2522 = vmatmul.mubr.msk.f32.vlgmr.msra.gmra.mrb[20].mxu0 %vm275_vm0, %v1825_v31  ;;  %2523 = vmatmul.mubr.msk.f32.vlgmr.msra.gmra.mrb[20].mxu1 %vm275_vm0, %v1825_v31 }
 0x837   :  { %2694 = vmatpush1.bf16.msra.mxu0 %v3007_v45  ;;  %2698 = vmatpush1.bf16.msra.mxu1 %v3010_v46 }
 0x838   :  { %2090 = vmatprep.mubr.f32.mxu0 %v2763_v3  ;;  %2161 = vmatprep.mubr.f32.mxu1 %v2763_v3 }
 0x839   :  { %2701 = vmatprep.subr.msk.bf16.mxu0 %vm2700_vm2, %v2699_v61  ;;  %2707 = vmatprep.subr.msk.bf16.mxu1 %vm2706_vm7, %v2699_v61 }
 0x83d   :  { %v2215_v32 = vld [vmem:[#allocation3] sm:$0xff] }
 0x83e   :  { %2491 = vrot.lane.b32.xlu1 %v2215_v32, %s2765_s22 }
 0x909   :  { %v1898_v33 = vpop.f32.mrb[20].mxu0  ;;  %v1969_v34 = vpop.f32.mrb[20].mxu1 }
 0x90a   :  { %v1900_v35 = vpop.f32.mrb[21].mxu0  ;;  %v1971_v36 = vpop.f32.mrb[21].mxu1 }
 0x90b   :  { %v1978_v37 = vcombine.low %v1898_v33, %v1900_v35  ;;  %v1979_v39 = vcombine.low %v1969_v34, %v1971_v36 }
 0x90d   :  { %v1986_v40 = vrot.slane %v1978_v37, %v3046_v16  ;;  %v1993_v45 = vrot.slane %v1979_v39, %v3046_v16 }
 0x90f   :  { %v1994_v42 = vcombine.low %v1986_v40, %v1993_v45  ;;  %v2327_v40 = vand.u32 127, %v92_v49 }
 0x911   :  { %v2001_v46 = vrot.slane %v1994_v42, %v3046_v16  ;;  %vm2328_vm8 = vcmp.eq.s32.totalorder %v2327_v40, 9  ;;  %vm2486_vm15 = vcmp.lt.s32.totalorder %v2327_v40, 4 }
 0x913   :  { %v2003_v44 = vadd.f32 %v2001_v46, %v1828_v43 }
 0x915   :  { %2747 = vtanh.f32 %v2003_v44 }
 0x91f   :  { %v2748_v3 = vpop.eup %2747 }
 0x920   :  { %v2005_v47 = vmul.f32 0.5, %v2748_v3  ;;  %v2012_v51 = vrot.slane %v2748_v3, 2 }
 0x922   :  { %v2006_v48 = vadd.f32 0.5, %v2005_v47 }
 0x924   :  { %v2008_v52 = vrot.slane %v2006_v48, 1  ;;  %v2014_v54 = vmul.f32 %v2012_v51, %v2006_v48  ;;  %v2017_v56 = vrot.slane %v2006_v48, 3 }
 0x926   :  { %v2010_v53 = vmul.f32 %v2008_v52, %v1821_v28 }
 0x928   :  { %v2015_v55 = vadd.f32 %v2014_v54, %v2010_v53 }
 0x92a   :  { %2749 = vtanh.f32 %v2015_v55 }
 0x934   :  { %v2750_v57 = vpop.eup %2749 }
 0x935   :  { %v2019_v58 = vmul.f32 %v2750_v57, %v2017_v56 }
 0x937   :  { %2020 = vst.msk [vmem:[#allocation3 + $0x8] sm:$0x1] %vm467_vm1, %v2019_v58  ;;  %2524 = vmatmul.mubr.msk.f32.vlgmr.msra.gmra.mrb[22].mxu0 %vm275_vm0, %v2019_v58  ;;  %2525 = vmatmul.mubr.msk.f32.vlgmr.msra.gmra.mrb[22].mxu1 %vm275_vm0, %v2019_v58 }
 0x938   :  { %2545 = vmatprep.mubr.msk.f32.mxu0 %vm275_vm0, %v2215_v32  ;;  %2704 = vmatpush3.bf16.xpose.msk.msra.mxu0 %vm2700_vm2, %v2699_v61  ;;  %vm2497_vm2 = vcmask 261248  }
 0x939   :  { %2710 = vmatpush3.bf16.msk.msra.mxu1 %vm2706_vm7, %v2699_v61 }
 0xa0a   :  { %v2092_v62 = vpop.f32.mrb[22].mxu0  ;;  %v2163_v63 = vpop.f32.mrb[22].mxu1 }
 0xa0b   :  { %v2094_v0 = vpop.f32.mrb[23].mxu0  ;;  %v2165_v1 = vpop.f32.mrb[23].mxu1 }
 0xa0c   :  { %v2172_v2 = vcombine.low %v2092_v62, %v2094_v0  ;;  %v2173_v4 = vcombine.low %v2163_v63, %v2165_v1 }
 0xa0e   :  { %v2180_v5 = vrot.slane %v2172_v2, %v3046_v16  ;;  %v2187_v6 = vrot.slane %v2173_v4, %v3046_v16 }
 0xa10   :  { %v2188_v7 = vcombine.low %v2180_v5, %v2187_v6 }
 0xa12   :  { %v2195_v8 = vrot.slane %v2188_v7, %v3046_v16 }
 0xa14   :  { %v2197_v10 = vadd.f32 %v2195_v8, %v2022_v9  ;;  %v2476_v9 = vsel %vm275_vm0, %v3156_v59, 0.0 }
 0xa16   :  { %2751 = vtanh.f32 %v2197_v10  ;;  %v2478_v10 = vsel %vm2477_vm14, %v3161_v60, 0.0 }
 0xa20   :  { %v2752_v11 = vpop.eup %2751 }
 0xa21   :  { %v2199_v12 = vmul.f32 0.5, %v2752_v11  ;;  %v2206_v15 = vrot.slane %v2752_v11, 2  ;;  %v2479_v11 = vadd.f32 %v2478_v10, %v2476_v9 }
 0xa23   :  { %v2200_v13 = vadd.f32 0.5, %v2199_v12  ;;  %v2480_v50 = vrot.slane %v2479_v11, 4 }
 0xa25   :  { %v2202_v14 = vrot.slane %v2200_v13, 1  ;;  %v2208_v18 = vmul.f32 %v2206_v15, %v2200_v13  ;;  %v2211_v20 = vrot.slane %v2200_v13, 3  ;;  %v2481_v12 = vadd.f32 %v2480_v50, %v2479_v11 }
 0xa27   :  { %v2204_v17 = vmul.f32 %v2202_v14, %v2015_v55  ;;  %v2482_v13 = vrot.slane %v2481_v12, 2 }
 0xa29   :  { %v2209_v19 = vadd.f32 %v2208_v18, %v2204_v17  ;;  %v2483_v14 = vadd.f32 %v2482_v13, %v2481_v12  ;;  %v2492_v18 = vpop.permute.xlu1 %2491 }
 0xa2b   :  { %2753 = vtanh.f32 %v2209_v19  ;;  %v2484_v15 = vrot.slane %v2483_v14, 1 }
 0xa2d   :  { %v2485_v17 = vadd.f32 %v2484_v15, %v2483_v14 }
 0xa35   :  { %v2754_v21 = vpop.eup %2753 }
 0xa36   :  { %v2213_v22 = vmul.f32 %v2754_v21, %v2211_v20 }
 0xa38   :  { %2214 = vst.msk [vmem:[#allocation3 + $0x9] sm:$0x1] %vm467_vm1, %v2213_v22  ;;  %vm2499_vm1 = vcmask 255104  }
 0xa3f   :  { %v2216_v23 = vld [vmem:[#allocation3 + $0x8] sm:$0x3] }
 0xa40   :  { %2493 = vrot.lane.b32.xlu1 %v2216_v23, %s2765_s22  ;;  %2546 = vmatmul.mubr.msk.f32.vlgmr.msra.gmra.mrb[24].mxu0 %vm275_vm0, %v2216_v23 }
 0xab2   :  { %v2494_v22 = vpop.permute.xlu1 %2493 }
 0xb13   :  { %v2547_v16 = vpop.f32.mrb[24].mxu0 }
 0xb14   :  { %v2295_v38 = vpop.f32.mrb[25].mxu0  ;;  %v2306_v24 = vmul.f32 1.442695, %v2547_v16 }
 0xb15   :  { %v2304_v41 = vmul.f32 1.442695, %v2295_v38 }
 0xb17   :  { %2755 = vpow2.f32 %v2304_v41 }
 0xb18   :  { %2757 = vpow2.f32 %v2306_v24 }
 0xb21   :  { %v2756_v25 = vpop.eup %2755 }
 0xb22   :  { %v2309_v26 = vsel %vm2308_vm3, %v2756_v25, 0.0  ;;  %v2758_v27 = vpop.eup %2757 }
 0xb23   :  { %2310 = vadd.xlane.f32.xlu0 %v2309_v26  ;;  %v2313_v28 = vsel %vm2312_vm4, %v2758_v27, 0.0 }
 0xb27   :  { %2314 = vadd.xlane.f32.xlu0 %v2313_v28 }
 0xbb0   :  { %v2311_v29 = vpop.xlane.xlu0 %2310 }
 0xbb1   :  { %v2316_v30 = vmul.f32 %v2311_v29, %v2311_v29 }
 0xbb3   :  { %v2318_v31 = vmul.f32 %v2316_v30, %v2316_v30 }
 0xbb4   :  { %v2315_v32 = vpop.xlane.xlu0 %2314 }
 0xbb5   :  { %v2320_v33 = vmul.f32 %v2318_v31, %v2318_v31  ;;  %v2317_v34 = vmul.f32 %v2315_v32, %v2315_v32 }
 0xbb7   :  { %v2322_v35 = vmul.f32 %v2320_v33, %v2316_v30  ;;  %v2319_v36 = vmul.f32 %v2317_v34, %v2317_v34 }
 0xbb9   :  { %2759 = vrcp.f32 %v2322_v35  ;;  %v2321_v37 = vmul.f32 %v2319_v36, %v2319_v36 }
 0xbbb   :  { %v2323_v39 = vmul.f32 %v2321_v37, %v2317_v34 }
 0xbbd   :  { %2761 = vrcp.f32 %v2323_v39 }
 0xbc3   :  { %v2760_v45 = vpop.eup %2759 }
 0xbc4   :  { %v2329_v42 = vsel %vm2328_vm8, %v2760_v45, 1.0 }
 0xbc5   :  { %v2331_v43 = vmul.f32 %v2756_v25, %v2329_v42 }
 0xbc7   :  { %v2762_v46 = vpop.eup %2761  ;;  %v2343_v48 = vrot.slane %v2331_v43, 7 }
 0xbc8   :  { %v2330_v44 = vsel %vm2328_vm8, %v2762_v46, 1.0 }
 0xbc9   :  { %v2332_v3 = vmul.f32 %v2758_v27, %v2330_v44 }
 0xbcb   :  { %v2339_v47 = vrot.slane %v2332_v3, 1  ;;  %v2344_v51 = vrot.slane %v2332_v3, 7 }
 0xbcd   :  { %v2348_v52 = vsel %vm2342_vm9, %v2339_v47, %v2343_v48  ;;  %v2345_v53 = vsel %vm2342_vm9, %v2343_v48, %v2344_v51 }
 0xbce   :  { %v2349_v54 = vsel %vm2336_vm10, %v2348_v52, 1.0  ;;  %v2352_v56 = vmul.f32 %v2345_v53, %v2332_v3 }
 0xbcf   :  { %v2351_v55 = vmul.f32 %v2349_v54, %v2331_v43 }
 0xbd1   :  { %v2356_v49 = vrot.slane %v2351_v55, 6 }
 0xbd3   :  { %v2359_v57 = vsel %vm2358_vm5, %v2352_v56, %v2356_v49  ;;  %v2363_v58 = vmul.f32 %v2356_v49, %v2352_v56 }
 0xbd4   :  { %v2360_v61 = vsel %vm2353_vm11, %v2359_v57, 1.0 }
 0xbd5   :  { %v2362_v62 = vmul.f32 %v2360_v61, %v2351_v55  ;;  %v2369_v0 = vrot.slane %v2363_v58, 6 }
 0xbd7   :  { %v2368_v63 = vrot.slane %v2362_v62, 6  ;;  %v2372_v1 = vrot.slane %v2362_v62, 4 }
 0xbd9   :  { %v2370_v2 = vsel %vm2358_vm5, %v2368_v63, %v2369_v0  ;;  %v2379_v7 = vmul.f32 %v2372_v1, %v2363_v58 }
 0xbda   :  { %v2375_v4 = vsel %vm2374_vm12, %v2370_v2, %v2372_v1 }
 0xbdb   :  { %v2376_v5 = vsel %vm2364_vm13, %v2375_v4, 1.0 }
 0xbdc   :  { %v2378_v6 = vmul.f32 %v2376_v5, %v2362_v62 }
 0xbde   :  { %v2392_v8 = vmul.f32 %v2379_v7, %v2378_v6  ;;  %2552 = vmatprep.mubr.msk.f32.mxu1 %vm2308_vm3, %v2378_v6 }
 0xbe0   :  { %2553 = vmatmul.mubr.msk.f32.vlgmr.msra.gmra.mrb[24].mxu1 %vm2308_vm3, %v2392_v8 }
 0xcb3   :  { %v2554_v19 = vpop.f32.mrb[24].mxu1 }
 0xcb4   :  { %v2488_v20 = vsel %vm2486_vm15, %v2554_v19, %v2485_v17  ;;  %v2467_v21 = vpop.f32.mrb[25].mxu1 }
 0xcb5   :  { %2490 = vst.msk [vmem:[%s3203_s2 + $0x8] sm:$0x3] %vm2477_vm14, %v2488_v20  ;;  %v2487_v59 = vsel %vm2486_vm15, %v2467_v21, %v2485_v17 }
 0xcb6   :  { %2500 = vst.msk [vmem:[%s3203_s2 + $0x8] sm:$0x3] %vm2499_vm1, %v2494_v22 }
 0xcb7   :  { %2489 = vst.msk [vmem:[%s3203_s2] sm:$0xff] %vm275_vm0, %v2487_v59 }
 0xcb8   :  { %2498 = vst.msk [vmem:[%s3203_s2] sm:$0xff] %vm2497_vm2, %v2492_v18 }

</bundles_post_ra>
